<compile_context>
chip_gen: v7x
topology: tpu7x:2x2x1
jax: 0.10.0
libtpu: 0.0.40
codegen_flags: <defaults>
</compile_context>

<pallas_src>
import jax
import jax.numpy as jnp
from jax import lax
from jax.experimental import pallas as pl
from jax.experimental.pallas import tpu as pltpu


def _round_up(x, m):
    return ((x + m - 1) // m) * m


def _largest_divisor(n, cap):
    best = 1
    for c in range(1, min(n, cap) + 1):
        if n % c == 0:
            best = c
    return best


def _vmem_limit(nbytes):
    # 2x headroom, clamped to [32 MiB, 64 MiB] so it is valid on v7x too.
    return int(min(max(2 * nbytes, 32 * 1024 * 1024), 64 * 1024 * 1024))


# PyTorch LSTM gate order is (i, f, g, o); we permute to (i, f, o, g) so the three
# sigmoids are contiguous and the tanh gate is last.
_GATE_PERM = (0, 1, 3, 2)


# ----------------------------------------------------------------------------
# Kernel 1: serial LSTM recurrence, S-chunked grid, (h, c) carried in VMEM scratch.
# ----------------------------------------------------------------------------
def lstm_recurrence_kernel(gx_ref, whh_ref, h0_ref, c0_ref,
                           h_all_ref, hT_ref, cT_ref, h_sc, c_sc):
    """gx_ref : (S_CHUNK, B, 4*Hp) f32   pre-projected input gates (x@W_ih^T + b), padded,
                                         gate order (i, f, o, g)
       whh_ref: (Hp, 4*Hp)        bf16   transposed recurrent weight, padded, same order
       h0/c0  : (B, Hp)           f32    initial state, padded
       h_all  : (S_CHUNK, B, Hp)  bf16   hidden state at every step (FC kernel input)
       hT/cT  : (B, Hp)           f32    final state (written on the last chunk)
       h_sc/c_sc : (B, Hp)        f32    VMEM scratch carrying (h, c) across chunks
    """
    @pl.when(pl.program_id(0) == 0)
    def _():
        h_sc[...] = h0_ref[...]
        c_sc[...] = c0_ref[...]

    s_chunk = gx_ref.shape[0]
    Hp = h0_ref.shape[-1]
    w_hh = whh_ref[...]

    def step(t, carry):
        h, c = carry
        gates = gx_ref[t] + jnp.dot(h.astype(w_hh.dtype), w_hh,
                                    preferred_element_type=jnp.float32)
        # Gate order (i, f, o, g): one sigmoid over the first 3*Hp lanes,
        # one tanh over the last Hp lanes.  All slice boundaries are multiples of 128.
        sig = jax.nn.sigmoid(gates[:, 0:3 * Hp])
        i_g = sig[:, 0 * Hp:1 * Hp]
        f_g = sig[:, 1 * Hp:2 * Hp]
        o_g = sig[:, 2 * Hp:3 * Hp]
        g_g = jnp.tanh(gates[:, 3 * Hp:4 * Hp])
        c_new = f_g * c + i_g * g_g
        h_new = o_g * jnp.tanh(c_new)
        h_all_ref[t] = h_new.astype(h_all_ref.dtype)   # lane-dense bf16 store
        return (h_new, c_new)

    unroll = s_chunk if s_chunk <= 8 else 4
    h, c = lax.fori_loop(0, s_chunk, step, (h_sc[...], c_sc[...]), unroll=unroll)
    h_sc[...] = h
    c_sc[...] = c

    @pl.when(pl.program_id(0) == pl.num_programs(0) - 1)
    def _():
        hT_ref[...] = h
        cT_ref[...] = c


# ----------------------------------------------------------------------------
# Kernel 2: hoisted output projection; weight block resident across row tiles.
# ----------------------------------------------------------------------------
def fc_kernel(h_ref, w_ref, b_ref, o_ref):
    """(TM, Hp) bf16 @ (Hp, TN) bf16 + (1, TN) f32 -> (TM, TN) f32; TN % 128 == 0."""
    o_ref[...] = (jnp.dot(h_ref[...], w_ref[...],
                          preferred_element_type=jnp.float32)
                  + b_ref[...])


# ----------------------------------------------------------------------------
# Wrapper: mirror of TextRNN.forward(x, hidden) in eval mode.
# ----------------------------------------------------------------------------
def textrnn_forward(x_idx, params, hidden, *, weight_dtype=jnp.bfloat16):
    """x_idx  : (S, B, 1) int32 token indices (time-major, like PyTorch LSTM)
       hidden : (h0, c0), each (1, B, H)
       returns (logits (S, B, V) f32, (hT (1,B,H), cT (1,B,H)))
    """
    emb = params["embedding"]            # (V, E)
    w_ih_t = params["w_ih_t"]            # (E, 4H)
    w_hh_t = params["w_hh_t"]            # (H, 4H)
    b = params["b"]                      # (1, 4H)  (b_ih + b_hh)
    wfc_t = params["wfc_t"]              # (H, V)
    bfc = params["bfc"]                  # (1, V)

    h0, c0 = hidden
    h0 = h0[0].astype(jnp.float32)       # (B, H)   (n_layers == 1)
    c0 = c0[0].astype(jnp.float32)

    V, E = emb.shape
    H = h0.shape[-1]
    S, B, _ = x_idx.shape

    Hp = _round_up(H, 128)               # lane-aligned hidden size
    perm = list(_GATE_PERM)

    # ---- Hoisted input projection: fold Embedding + x@W_ih^T + bias into a
    # gate table; per-token contribution becomes a row gather (JAX glue). -----
    emb_proj = jnp.dot(emb.astype(jnp.float32), w_ih_t.astype(jnp.float32),
                       preferred_element_type=jnp.float32) + b        # (V, 4H), (i,f,g,o)
    emb_proj = emb_proj.reshape(V, 4, H)[:, perm]                      # -> (i,f,o,g)
    emb_proj = jnp.pad(emb_proj, ((0, 0), (0, 0), (0, Hp - H))).reshape(V, 4 * Hp)
    gates_x = emb_proj[x_idx[:, :, 0]]                                 # (S, B, 4Hp) f32

    # ---- Padded / bf16 weights (same gate permutation as emb_proj) ----------
    w_hh_p = w_hh_t.reshape(H, 4, H)[:, perm]
    w_hh_p = jnp.pad(w_hh_p, ((0, Hp - H), (0, 0), (0, Hp - H))).reshape(Hp, 4 * Hp)
    w_hh_p = w_hh_p.astype(weight_dtype)
    h0_p = jnp.pad(h0, ((0, 0), (0, Hp - H)))
    c0_p = jnp.pad(c0, ((0, 0), (0, Hp - H)))
    # Padded-lane invariant: gates_x pad cols == 0 and c0 pad lanes == 0, so
    # c_pad = sigmoid(0)*c_pad + sigmoid(0)*tanh(0) = 0 and h_pad = sigmoid(0)*tanh(0) = 0
    # at every step.

    # ---- Serial recurrence: S-chunked grid, (h, c) carried in VMEM scratch --
    S_CHUNK = _largest_divisor(S, 32)
    n_chunks = S // S_CHUNK

    rec_bytes = (2 * S_CHUNK * B * 4 * Hp * 4        # gates_x chunk, f32, 2 buffers
                 + 2 * S_CHUNK * B * Hp * 2          # h_all chunk, bf16, 2 buffers
                 + 2 * Hp * 4 * Hp * 2               # W_hh, bf16
                 + 8 * B * Hp * 4                    # h0/c0/hT/cT
                 + 2 * B * Hp * 4)                   # scratch h/c

    full2 = lambda shape: pl.BlockSpec(shape, lambda s: (0, 0))

    h_all, hT_p, cT_p = pl.pallas_call(
        lstm_recurrence_kernel,
        out_shape=(
            jax.ShapeDtypeStruct((S, B, Hp), jnp.bfloat16),
            jax.ShapeDtypeStruct((B, Hp), jnp.float32),
            jax.ShapeDtypeStruct((B, Hp), jnp.float32),
        ),
        grid=(n_chunks,),
        in_specs=[
            pl.BlockSpec((S_CHUNK, B, 4 * Hp), lambda s: (s, 0, 0)),  # gates_x (streamed)
            full2((Hp, 4 * Hp)),                                      # W_hh (resident)
            full2((B, Hp)),                                           # h0
            full2((B, Hp)),                                           # c0
        ],
        out_specs=[
            pl.BlockSpec((S_CHUNK, B, Hp), lambda s: (s, 0, 0)),      # h_all (streamed)
            full2((B, Hp)),                                           # hT
            full2((B, Hp)),                                           # cT
        ],
        scratch_shapes=[
            pltpu.VMEM((B, Hp), jnp.float32),                         # h carry
            pltpu.VMEM((B, Hp), jnp.float32),                         # c carry
        ],
        compiler_params=pltpu.CompilerParams(
            dimension_semantics=("arbitrary",),                       # recurrence is serial
            vmem_limit_bytes=_vmem_limit(rec_bytes),
        ),
    )(gates_x, w_hh_p, h0_p, c0_p)

    # ---- Dropout(p=0.2): identity in eval mode ------------------------------

    # ---- Hoisted output projection: (S*B, Hp) @ (Hp, Vp), big lane-dense tiles,
    # row axis innermost so each W_fc block is fetched from HBM exactly once. --
    M = S * B
    TM = min(256, _round_up(M, 8))
    Mp = _round_up(M, TM)
    TN = min(512, _round_up(V, 128))
    Vp = _round_up(V, TN)

    wfc_p = jnp.pad(wfc_t, ((0, Hp - H), (0, Vp - V))).astype(weight_dtype)
    bfc_p = jnp.pad(bfc, ((0, 0), (0, Vp - V))).astype(jnp.float32)

    h_flat = h_all.reshape(M, Hp)
    if Mp != M:
        h_flat = jnp.pad(h_flat, ((0, Mp - M), (0, 0)))

    fc_bytes = 2 * (TM * Hp * 2 + Hp * TN * 2 + TN * 4 + TM * TN * 4)

    logits_flat = pl.pallas_call(
        fc_kernel,
        out_shape=jax.ShapeDtypeStruct((Mp, Vp), jnp.float32),
        grid=(Vp // TN, Mp // TM),                 # vocab tile OUTER, row tile INNER
        in_specs=[
            pl.BlockSpec((TM, Hp), lambda j, i: (i, 0)),   # h tile (changes every step)
            pl.BlockSpec((Hp, TN), lambda j, i: (0, j)),   # W_fc tile (constant over inner axis)
            pl.BlockSpec((1, TN), lambda j, i: (0, j)),    # bias tile
        ],
        out_specs=pl.BlockSpec((TM, TN), lambda j, i: (i, j)),
        compiler_params=pltpu.CompilerParams(
            dimension_semantics=("parallel", "parallel"),  # shardable across v7x's 2 TCs
            vmem_limit_bytes=_vmem_limit(fc_bytes),
        ),
    )(h_flat, wfc_p, bfc_p)

    logits = logits_flat[:M, :V].reshape(S, B, V)
    hT = hT_p[:, :H][None]
    cT = cT_p[:, :H][None]
    return logits, (hT, cT)


def make_params(key, vocab, hidden, embedding):
    ks = jax.random.split(key, 7)
    scale = 0.1
    emb = scale * jax.random.normal(ks[0], (vocab, embedding), jnp.float32)
    w_ih = scale * jax.random.normal(ks[1], (4 * hidden, embedding), jnp.float32)
    w_hh = scale * jax.random.normal(ks[2], (4 * hidden, hidden), jnp.float32)
    b_ih = scale * jax.random.normal(ks[3], (4 * hidden,), jnp.float32)
    b_hh = scale * jax.random.normal(ks[4], (4 * hidden,), jnp.float32)
    wfc = scale * jax.random.normal(ks[5], (vocab, hidden), jnp.float32)
    bfc = scale * jax.random.normal(ks[6], (vocab,), jnp.float32)
    return {
        "embedding": emb,
        "w_ih_t": w_ih.T,                       # (E, 4H)
        "w_hh_t": w_hh.T,                       # (H, 4H)
        "b": (b_ih + b_hh)[None, :],            # (1, 4H)  (b_ih + b_hh)
        "wfc_t": wfc.T,                         # (H, V)
        "bfc": bfc[None, :],                    # (1, V)
    }


def reference_forward(x_idx, params, hidden, *, weight_dtype=jnp.bfloat16):
    """Pure-JAX reference (lax.scan LSTM), mirroring the kernel's bf16 weight/h casts.
    Uses the standard PyTorch (i,f,g,o) gate order; the kernel's column permutation is
    numerically identical."""
    emb = params["embedding"]
    h0, c0 = hidden[0][0], hidden[1][0]
    x_emb = jnp.squeeze(emb[x_idx], axis=2).astype(jnp.float32)
    H = h0.shape[-1]
    w_hh = params["w_hh_t"].astype(weight_dtype)
    wfc = params["wfc_t"].astype(weight_dtype)

    def step(carry, x_t):
        h, c = carry
        gates = (jnp.dot(x_t, params["w_ih_t"], preferred_element_type=jnp.float32)
                 + params["b"]
                 + jnp.dot(h.astype(weight_dtype), w_hh,
                           preferred_element_type=jnp.float32))
        i_g = jax.nn.sigmoid(gates[:, 0 * H:1 * H])
        f_g = jax.nn.sigmoid(gates[:, 1 * H:2 * H])
        g_g = jnp.tanh(gates[:, 2 * H:3 * H])
        o_g = jax.nn.sigmoid(gates[:, 3 * H:4 * H])
        c_new = f_g * c + i_g * g_g
        h_new = o_g * jnp.tanh(c_new)
        y = jnp.dot(h_new.astype(weight_dtype), wfc,
                    preferred_element_type=jnp.float32) + params["bfc"]
        return (h_new, c_new), y

    (hT, cT), ys = jax.lax.scan(step, (h0, c0), x_emb)
    return ys, (hT[None], cT[None])


if __name__ == "__main__":
    VOCAB, HIDDEN, EMB = 64, 32, 16       # input_size, hidden_size, embedding_size
    SEQ, BATCH, N_LAYERS = 8, 2, 1

    key = jax.random.PRNGKey(0)
    k_param, k_x = jax.random.split(key)
    params = make_params(k_param, VOCAB, HIDDEN, EMB)

    x_idx = jax.random.randint(k_x, (SEQ, BATCH, 1), 0, VOCAB, dtype=jnp.int32)
    hidden = (jnp.zeros((N_LAYERS, BATCH, HIDDEN), jnp.float32),
              jnp.zeros((N_LAYERS, BATCH, HIDDEN), jnp.float32))

    logits, (hT, cT) = jax.block_until_ready(textrnn_forward(x_idx, params, hidden))

    ref_logits, (ref_hT, ref_cT) = reference_forward(x_idx, params, hidden)
    assert logits.shape == (SEQ, BATCH, VOCAB)
    assert hT.shape == (N_LAYERS, BATCH, HIDDEN) and cT.shape == (N_LAYERS, BATCH, HIDDEN)
    assert jnp.allclose(logits, ref_logits, atol=1e-4, rtol=1e-4)
    assert jnp.allclose(hT, ref_hT, atol=1e-4, rtol=1e-4)
    assert jnp.allclose(cT, ref_cT, atol=1e-4, rtol=1e-4)

    print("KERNEL_OK")
</pallas_src>

<mosaic_0001>
module attributes {stable_mosaic.version = 11 : i64} {
  func.func @lstm_recurrence_kernel(%arg0: i32, %arg1: memref<8x2x512xf32, #tpu.memory_space<vmem>>, %arg2: memref<128x512xbf16, #tpu.memory_space<vmem>>, %arg3: memref<2x128xf32, #tpu.memory_space<vmem>>, %arg4: memref<2x128xf32, #tpu.memory_space<vmem>>, %arg5: memref<8x2x128xbf16, #tpu.memory_space<vmem>>, %arg6: memref<2x128xf32, #tpu.memory_space<vmem>>, %arg7: memref<2x128xf32, #tpu.memory_space<vmem>>, %arg8: memref<2x128xf32, #tpu.memory_space<vmem>>, %arg9: memref<2x128xf32, #tpu.memory_space<vmem>>) attributes {dimension_semantics = [#tpu.dimension_semantics<arbitrary>], iteration_bounds = array<i64: 1>, scalar_prefetch = 0 : i64, scratch_operands = 2 : i64, tpu.core_type = #tpu.core_type<tc>, window_params = [{transform_indices = @transform_0, window_bounds = array<i64: 8, 2, 512>}, {pipeline_mode = #tpu.pipeline_mode<synchronous>, transform_indices = @transform_1, window_bounds = array<i64: 128, 512>}, {pipeline_mode = #tpu.pipeline_mode<synchronous>, transform_indices = @transform_2, window_bounds = array<i64: 2, 128>}, {pipeline_mode = #tpu.pipeline_mode<synchronous>, transform_indices = @transform_3, window_bounds = array<i64: 2, 128>}, {transform_indices = @transform_4, window_bounds = array<i64: 8, 2, 128>}, {pipeline_mode = #tpu.pipeline_mode<synchronous>, transform_indices = @transform_5, window_bounds = array<i64: 2, 128>}, {pipeline_mode = #tpu.pipeline_mode<synchronous>, transform_indices = @transform_6, window_bounds = array<i64: 2, 128>}]} {
    %c0_i32 = arith.constant 0 : i32
    %0 = arith.cmpi eq, %arg0, %c0_i32 : i32
    %1 = arith.extui %0 : i1 to i32
    %c0_i32_0 = arith.constant 0 : i32
    %2 = arith.cmpi ne, %1, %c0_i32_0 : i32
    scf.if %2 {
      %c0_60 = arith.constant 0 : index
      %c0_61 = arith.constant 0 : index
      %227 = vector.load %arg3[%c0_60, %c0_61] : memref<2x128xf32, #tpu.memory_space<vmem>>, vector<2x128xf32>
      %c0_62 = arith.constant 0 : index
      %c0_63 = arith.constant 0 : index
      %228 = vector.load %arg8[%c0_62, %c0_63] : memref<2x128xf32, #tpu.memory_space<vmem>>, vector<2x128xf32>
      tpu.vector_store %arg8[%c0_62, %c0_63], %227 {strides = array<i32>} : memref<2x128xf32, #tpu.memory_space<vmem>>, vector<2x128xf32>,
      %c0_64 = arith.constant 0 : index
      %c0_65 = arith.constant 0 : index
      %229 = vector.load %arg4[%c0_64, %c0_65] : memref<2x128xf32, #tpu.memory_space<vmem>>, vector<2x128xf32>
      %c0_66 = arith.constant 0 : index
      %c0_67 = arith.constant 0 : index
      %230 = vector.load %arg9[%c0_66, %c0_67] : memref<2x128xf32, #tpu.memory_space<vmem>>, vector<2x128xf32>
      tpu.vector_store %arg9[%c0_66, %c0_67], %229 {strides = array<i32>} : memref<2x128xf32, #tpu.memory_space<vmem>>, vector<2x128xf32>,
    } else {
    }
    %c0 = arith.constant 0 : index
    %c0_1 = arith.constant 0 : index
    %3 = vector.load %arg2[%c0, %c0_1] : memref<128x512xbf16, #tpu.memory_space<vmem>>, vector<128x512xbf16>
    %c0_2 = arith.constant 0 : index
    %c0_3 = arith.constant 0 : index
    %4 = vector.load %arg8[%c0_2, %c0_3] : memref<2x128xf32, #tpu.memory_space<vmem>>, vector<2x128xf32>
    %c0_4 = arith.constant 0 : index
    %c0_5 = arith.constant 0 : index
    %5 = vector.load %arg9[%c0_4, %c0_5] : memref<2x128xf32, #tpu.memory_space<vmem>>, vector<2x128xf32>
    %c0_i32_6 = arith.constant 0 : i32
    %6 = arith.index_cast %c0_i32_6 : i32 to index
    %c0_7 = arith.constant 0 : index
    %c0_8 = arith.constant 0 : index
    %7 = vector.load %arg1[%6, %c0_7, %c0_8] : memref<8x2x512xf32, #tpu.memory_space<vmem>>, vector<1x2x512xf32>
    %8 = vector.shape_cast %7 : vector<1x2x512xf32> to vector<2x512xf32>
    %9 = arith.truncf %4 : vector<2x128xf32> to vector<2x128xbf16>
    %cst = arith.constant dense<0.000000e+00> : vector<2x512xf32>
    %10 = tpu.matmul %9, %3, %cst {dimension_numbers = #tpu.dot_dimension_numbers<[1], [0], [0], [1], [0, 0, 1, 1], [], []>} : vector<2x128xbf16>, vector<128x512xbf16>, vector<2x512xf32> -> vector<2x512xf32>
    %11 = arith.addf %8, %10 : vector<2x512xf32>
    %12 = vector.extract_strided_slice %11 {offsets = [0, 0], sizes = [2, 384], strides = [1, 1]} : vector<2x512xf32> to vector<2x384xf32>
    %13 = arith.negf %12 : vector<2x384xf32>
    %14 = math.exp %13 : vector<2x384xf32>
    %cst_9 = arith.constant 1.000000e+00 : f32
    %15 = vector.broadcast %cst_9 : f32 to vector<2x384xf32>
    %16 = arith.addf %15, %14 : vector<2x384xf32>
    %17 = arith.divf %15, %16 : vector<2x384xf32>
    %18 = vector.extract_strided_slice %17 {offsets = [0, 0], sizes = [2, 128], strides = [1, 1]} : vector<2x384xf32> to vector<2x128xf32>
    %19 = vector.extract_strided_slice %17 {offsets = [0, 128], sizes = [2, 128], strides = [1, 1]} : vector<2x384xf32> to vector<2x128xf32>
    %20 = vector.extract_strided_slice %17 {offsets = [0, 256], sizes = [2, 128], strides = [1, 1]} : vector<2x384xf32> to vector<2x128xf32>
    %21 = vector.extract_strided_slice %11 {offsets = [0, 384], sizes = [2, 128], strides = [1, 1]} : vector<2x512xf32> to vector<2x128xf32>
    %22 = math.tanh %21 : vector<2x128xf32>
    %23 = arith.mulf %19, %5 : vector<2x128xf32>
    %24 = arith.mulf %18, %22 : vector<2x128xf32>
    %25 = arith.addf %23, %24 : vector<2x128xf32>
    %26 = math.tanh %25 : vector<2x128xf32>
    %27 = arith.mulf %20, %26 : vector<2x128xf32>
    %28 = arith.truncf %27 : vector<2x128xf32> to vector<2x128xbf16>
    %29 = arith.index_cast %c0_i32_6 : i32 to index
    %c0_10 = arith.constant 0 : index
    %c0_11 = arith.constant 0 : index
    %30 = vector.load %arg5[%29, %c0_10, %c0_11] : memref<8x2x128xbf16, #tpu.memory_space<vmem>>, vector<1x2x128xbf16>
    %31 = vector.shape_cast %30 : vector<1x2x128xbf16> to vector<2x128xbf16>
    %32 = vector.shape_cast %28 : vector<2x128xbf16> to vector<1x2x128xbf16>
    tpu.vector_store %arg5[%29, %c0_10, %c0_11], %32 {strides = array<i32>} : memref<8x2x128xbf16, #tpu.memory_space<vmem>>, vector<1x2x128xbf16>,
    %c1_i32 = arith.constant 1 : i32
    %33 = arith.index_cast %c1_i32 : i32 to index
    %c0_12 = arith.constant 0 : index
    %c0_13 = arith.constant 0 : index
    %34 = vector.load %arg1[%33, %c0_12, %c0_13] : memref<8x2x512xf32, #tpu.memory_space<vmem>>, vector<1x2x512xf32>
    %35 = vector.shape_cast %34 : vector<1x2x512xf32> to vector<2x512xf32>
    %36 = arith.truncf %27 : vector<2x128xf32> to vector<2x128xbf16>
    %cst_14 = arith.constant dense<0.000000e+00> : vector<2x512xf32>
    %37 = tpu.matmul %36, %3, %cst_14 {dimension_numbers = #tpu.dot_dimension_numbers<[1], [0], [0], [1], [0, 0, 1, 1], [], []>} : vector<2x128xbf16>, vector<128x512xbf16>, vector<2x512xf32> -> vector<2x512xf32>
    %38 = arith.addf %35, %37 : vector<2x512xf32>
    %39 = vector.extract_strided_slice %38 {offsets = [0, 0], sizes = [2, 384], strides = [1, 1]} : vector<2x512xf32> to vector<2x384xf32>
    %40 = arith.negf %39 : vector<2x384xf32>
    %41 = math.exp %40 : vector<2x384xf32>
    %cst_15 = arith.constant 1.000000e+00 : f32
    %42 = vector.broadcast %cst_15 : f32 to vector<2x384xf32>
    %43 = arith.addf %42, %41 : vector<2x384xf32>
    %44 = arith.divf %42, %43 : vector<2x384xf32>
    %45 = vector.extract_strided_slice %44 {offsets = [0, 0], sizes = [2, 128], strides = [1, 1]} : vector<2x384xf32> to vector<2x128xf32>
    %46 = vector.extract_strided_slice %44 {offsets = [0, 128], sizes = [2, 128], strides = [1, 1]} : vector<2x384xf32> to vector<2x128xf32>
    %47 = vector.extract_strided_slice %44 {offsets = [0, 256], sizes = [2, 128], strides = [1, 1]} : vector<2x384xf32> to vector<2x128xf32>
    %48 = vector.extract_strided_slice %38 {offsets = [0, 384], sizes = [2, 128], strides = [1, 1]} : vector<2x512xf32> to vector<2x128xf32>
    %49 = math.tanh %48 : vector<2x128xf32>
    %50 = arith.mulf %46, %25 : vector<2x128xf32>
    %51 = arith.mulf %45, %49 : vector<2x128xf32>
    %52 = arith.addf %50, %51 : vector<2x128xf32>
    %53 = math.tanh %52 : vector<2x128xf32>
    %54 = arith.mulf %47, %53 : vector<2x128xf32>
    %55 = arith.truncf %54 : vector<2x128xf32> to vector<2x128xbf16>
    %56 = arith.index_cast %c1_i32 : i32 to index
    %c0_16 = arith.constant 0 : index
    %c0_17 = arith.constant 0 : index
    %57 = vector.load %arg5[%56, %c0_16, %c0_17] : memref<8x2x128xbf16, #tpu.memory_space<vmem>>, vector<1x2x128xbf16>
    %58 = vector.shape_cast %57 : vector<1x2x128xbf16> to vector<2x128xbf16>
    %59 = vector.shape_cast %55 : vector<2x128xbf16> to vector<1x2x128xbf16>
    tpu.vector_store %arg5[%56, %c0_16, %c0_17], %59 {strides = array<i32>} : memref<8x2x128xbf16, #tpu.memory_space<vmem>>, vector<1x2x128xbf16>,
    %c2_i32 = arith.constant 2 : i32
    %60 = arith.index_cast %c2_i32 : i32 to index
    %c0_18 = arith.constant 0 : index
    %c0_19 = arith.constant 0 : index
    %61 = vector.load %arg1[%60, %c0_18, %c0_19] : memref<8x2x512xf32, #tpu.memory_space<vmem>>, vector<1x2x512xf32>
    %62 = vector.shape_cast %61 : vector<1x2x512xf32> to vector<2x512xf32>
    %63 = arith.truncf %54 : vector<2x128xf32> to vector<2x128xbf16>
    %cst_20 = arith.constant dense<0.000000e+00> : vector<2x512xf32>
    %64 = tpu.matmul %63, %3, %cst_20 {dimension_numbers = #tpu.dot_dimension_numbers<[1], [0], [0], [1], [0, 0, 1, 1], [], []>} : vector<2x128xbf16>, vector<128x512xbf16>, vector<2x512xf32> -> vector<2x512xf32>
    %65 = arith.addf %62, %64 : vector<2x512xf32>
    %66 = vector.extract_strided_slice %65 {offsets = [0, 0], sizes = [2, 384], strides = [1, 1]} : vector<2x512xf32> to vector<2x384xf32>
    %67 = arith.negf %66 : vector<2x384xf32>
    %68 = math.exp %67 : vector<2x384xf32>
    %cst_21 = arith.constant 1.000000e+00 : f32
    %69 = vector.broadcast %cst_21 : f32 to vector<2x384xf32>
    %70 = arith.addf %69, %68 : vector<2x384xf32>
    %71 = arith.divf %69, %70 : vector<2x384xf32>
    %72 = vector.extract_strided_slice %71 {offsets = [0, 0], sizes = [2, 128], strides = [1, 1]} : vector<2x384xf32> to vector<2x128xf32>
    %73 = vector.extract_strided_slice %71 {offsets = [0, 128], sizes = [2, 128], strides = [1, 1]} : vector<2x384xf32> to vector<2x128xf32>
    %74 = vector.extract_strided_slice %71 {offsets = [0, 256], sizes = [2, 128], strides = [1, 1]} : vector<2x384xf32> to vector<2x128xf32>
    %75 = vector.extract_strided_slice %65 {offsets = [0, 384], sizes = [2, 128], strides = [1, 1]} : vector<2x512xf32> to vector<2x128xf32>
    %76 = math.tanh %75 : vector<2x128xf32>
    %77 = arith.mulf %73, %52 : vector<2x128xf32>
    %78 = arith.mulf %72, %76 : vector<2x128xf32>
    %79 = arith.addf %77, %78 : vector<2x128xf32>
    %80 = math.tanh %79 : vector<2x128xf32>
    %81 = arith.mulf %74, %80 : vector<2x128xf32>
    %82 = arith.truncf %81 : vector<2x128xf32> to vector<2x128xbf16>
    %83 = arith.index_cast %c2_i32 : i32 to index
    %c0_22 = arith.constant 0 : index
    %c0_23 = arith.constant 0 : index
    %84 = vector.load %arg5[%83, %c0_22, %c0_23] : memref<8x2x128xbf16, #tpu.memory_space<vmem>>, vector<1x2x128xbf16>
    %85 = vector.shape_cast %84 : vector<1x2x128xbf16> to vector<2x128xbf16>
    %86 = vector.shape_cast %82 : vector<2x128xbf16> to vector<1x2x128xbf16>
    tpu.vector_store %arg5[%83, %c0_22, %c0_23], %86 {strides = array<i32>} : memref<8x2x128xbf16, #tpu.memory_space<vmem>>, vector<1x2x128xbf16>,
    %c3_i32 = arith.constant 3 : i32
    %87 = arith.index_cast %c3_i32 : i32 to index
    %c0_24 = arith.constant 0 : index
    %c0_25 = arith.constant 0 : index
    %88 = vector.load %arg1[%87, %c0_24, %c0_25] : memref<8x2x512xf32, #tpu.memory_space<vmem>>, vector<1x2x512xf32>
    %89 = vector.shape_cast %88 : vector<1x2x512xf32> to vector<2x512xf32>
    %90 = arith.truncf %81 : vector<2x128xf32> to vector<2x128xbf16>
    %cst_26 = arith.constant dense<0.000000e+00> : vector<2x512xf32>
    %91 = tpu.matmul %90, %3, %cst_26 {dimension_numbers = #tpu.dot_dimension_numbers<[1], [0], [0], [1], [0, 0, 1, 1], [], []>} : vector<2x128xbf16>, vector<128x512xbf16>, vector<2x512xf32> -> vector<2x512xf32>
    %92 = arith.addf %89, %91 : vector<2x512xf32>
    %93 = vector.extract_strided_slice %92 {offsets = [0, 0], sizes = [2, 384], strides = [1, 1]} : vector<2x512xf32> to vector<2x384xf32>
    %94 = arith.negf %93 : vector<2x384xf32>
    %95 = math.exp %94 : vector<2x384xf32>
    %cst_27 = arith.constant 1.000000e+00 : f32
    %96 = vector.broadcast %cst_27 : f32 to vector<2x384xf32>
    %97 = arith.addf %96, %95 : vector<2x384xf32>
    %98 = arith.divf %96, %97 : vector<2x384xf32>
    %99 = vector.extract_strided_slice %98 {offsets = [0, 0], sizes = [2, 128], strides = [1, 1]} : vector<2x384xf32> to vector<2x128xf32>
    %100 = vector.extract_strided_slice %98 {offsets = [0, 128], sizes = [2, 128], strides = [1, 1]} : vector<2x384xf32> to vector<2x128xf32>
    %101 = vector.extract_strided_slice %98 {offsets = [0, 256], sizes = [2, 128], strides = [1, 1]} : vector<2x384xf32> to vector<2x128xf32>
    %102 = vector.extract_strided_slice %92 {offsets = [0, 384], sizes = [2, 128], strides = [1, 1]} : vector<2x512xf32> to vector<2x128xf32>
    %103 = math.tanh %102 : vector<2x128xf32>
    %104 = arith.mulf %100, %79 : vector<2x128xf32>
    %105 = arith.mulf %99, %103 : vector<2x128xf32>
    %106 = arith.addf %104, %105 : vector<2x128xf32>
    %107 = math.tanh %106 : vector<2x128xf32>
    %108 = arith.mulf %101, %107 : vector<2x128xf32>
    %109 = arith.truncf %108 : vector<2x128xf32> to vector<2x128xbf16>
    %110 = arith.index_cast %c3_i32 : i32 to index
    %c0_28 = arith.constant 0 : index
    %c0_29 = arith.constant 0 : index
    %111 = vector.load %arg5[%110, %c0_28, %c0_29] : memref<8x2x128xbf16, #tpu.memory_space<vmem>>, vector<1x2x128xbf16>
    %112 = vector.shape_cast %111 : vector<1x2x128xbf16> to vector<2x128xbf16>
    %113 = vector.shape_cast %109 : vector<2x128xbf16> to vector<1x2x128xbf16>
    tpu.vector_store %arg5[%110, %c0_28, %c0_29], %113 {strides = array<i32>} : memref<8x2x128xbf16, #tpu.memory_space<vmem>>, vector<1x2x128xbf16>,
    %c4_i32 = arith.constant 4 : i32
    %114 = arith.index_cast %c4_i32 : i32 to index
    %c0_30 = arith.constant 0 : index
    %c0_31 = arith.constant 0 : index
    %115 = vector.load %arg1[%114, %c0_30, %c0_31] : memref<8x2x512xf32, #tpu.memory_space<vmem>>, vector<1x2x512xf32>
    %116 = vector.shape_cast %115 : vector<1x2x512xf32> to vector<2x512xf32>
    %117 = arith.truncf %108 : vector<2x128xf32> to vector<2x128xbf16>
    %cst_32 = arith.constant dense<0.000000e+00> : vector<2x512xf32>
    %118 = tpu.matmul %117, %3, %cst_32 {dimension_numbers = #tpu.dot_dimension_numbers<[1], [0], [0], [1], [0, 0, 1, 1], [], []>} : vector<2x128xbf16>, vector<128x512xbf16>, vector<2x512xf32> -> vector<2x512xf32>
    %119 = arith.addf %116, %118 : vector<2x512xf32>
    %120 = vector.extract_strided_slice %119 {offsets = [0, 0], sizes = [2, 384], strides = [1, 1]} : vector<2x512xf32> to vector<2x384xf32>
    %121 = arith.negf %120 : vector<2x384xf32>
    %122 = math.exp %121 : vector<2x384xf32>
    %cst_33 = arith.constant 1.000000e+00 : f32
    %123 = vector.broadcast %cst_33 : f32 to vector<2x384xf32>
    %124 = arith.addf %123, %122 : vector<2x384xf32>
    %125 = arith.divf %123, %124 : vector<2x384xf32>
    %126 = vector.extract_strided_slice %125 {offsets = [0, 0], sizes = [2, 128], strides = [1, 1]} : vector<2x384xf32> to vector<2x128xf32>
    %127 = vector.extract_strided_slice %125 {offsets = [0, 128], sizes = [2, 128], strides = [1, 1]} : vector<2x384xf32> to vector<2x128xf32>
    %128 = vector.extract_strided_slice %125 {offsets = [0, 256], sizes = [2, 128], strides = [1, 1]} : vector<2x384xf32> to vector<2x128xf32>
    %129 = vector.extract_strided_slice %119 {offsets = [0, 384], sizes = [2, 128], strides = [1, 1]} : vector<2x512xf32> to vector<2x128xf32>
    %130 = math.tanh %129 : vector<2x128xf32>
    %131 = arith.mulf %127, %106 : vector<2x128xf32>
    %132 = arith.mulf %126, %130 : vector<2x128xf32>
    %133 = arith.addf %131, %132 : vector<2x128xf32>
    %134 = math.tanh %133 : vector<2x128xf32>
    %135 = arith.mulf %128, %134 : vector<2x128xf32>
    %136 = arith.truncf %135 : vector<2x128xf32> to vector<2x128xbf16>
    %137 = arith.index_cast %c4_i32 : i32 to index
    %c0_34 = arith.constant 0 : index
    %c0_35 = arith.constant 0 : index
    %138 = vector.load %arg5[%137, %c0_34, %c0_35] : memref<8x2x128xbf16, #tpu.memory_space<vmem>>, vector<1x2x128xbf16>
    %139 = vector.shape_cast %138 : vector<1x2x128xbf16> to vector<2x128xbf16>
    %140 = vector.shape_cast %136 : vector<2x128xbf16> to vector<1x2x128xbf16>
    tpu.vector_store %arg5[%137, %c0_34, %c0_35], %140 {strides = array<i32>} : memref<8x2x128xbf16, #tpu.memory_space<vmem>>, vector<1x2x128xbf16>,
    %c5_i32 = arith.constant 5 : i32
    %141 = arith.index_cast %c5_i32 : i32 to index
    %c0_36 = arith.constant 0 : index
    %c0_37 = arith.constant 0 : index
    %142 = vector.load %arg1[%141, %c0_36, %c0_37] : memref<8x2x512xf32, #tpu.memory_space<vmem>>, vector<1x2x512xf32>
    %143 = vector.shape_cast %142 : vector<1x2x512xf32> to vector<2x512xf32>
    %144 = arith.truncf %135 : vector<2x128xf32> to vector<2x128xbf16>
    %cst_38 = arith.constant dense<0.000000e+00> : vector<2x512xf32>
    %145 = tpu.matmul %144, %3, %cst_38 {dimension_numbers = #tpu.dot_dimension_numbers<[1], [0], [0], [1], [0, 0, 1, 1], [], []>} : vector<2x128xbf16>, vector<128x512xbf16>, vector<2x512xf32> -> vector<2x512xf32>
    %146 = arith.addf %143, %145 : vector<2x512xf32>
    %147 = vector.extract_strided_slice %146 {offsets = [0, 0], sizes = [2, 384], strides = [1, 1]} : vector<2x512xf32> to vector<2x384xf32>
    %148 = arith.negf %147 : vector<2x384xf32>
    %149 = math.exp %148 : vector<2x384xf32>
    %cst_39 = arith.constant 1.000000e+00 : f32
    %150 = vector.broadcast %cst_39 : f32 to vector<2x384xf32>
    %151 = arith.addf %150, %149 : vector<2x384xf32>
    %152 = arith.divf %150, %151 : vector<2x384xf32>
    %153 = vector.extract_strided_slice %152 {offsets = [0, 0], sizes = [2, 128], strides = [1, 1]} : vector<2x384xf32> to vector<2x128xf32>
    %154 = vector.extract_strided_slice %152 {offsets = [0, 128], sizes = [2, 128], strides = [1, 1]} : vector<2x384xf32> to vector<2x128xf32>
    %155 = vector.extract_strided_slice %152 {offsets = [0, 256], sizes = [2, 128], strides = [1, 1]} : vector<2x384xf32> to vector<2x128xf32>
    %156 = vector.extract_strided_slice %146 {offsets = [0, 384], sizes = [2, 128], strides = [1, 1]} : vector<2x512xf32> to vector<2x128xf32>
    %157 = math.tanh %156 : vector<2x128xf32>
    %158 = arith.mulf %154, %133 : vector<2x128xf32>
    %159 = arith.mulf %153, %157 : vector<2x128xf32>
    %160 = arith.addf %158, %159 : vector<2x128xf32>
    %161 = math.tanh %160 : vector<2x128xf32>
    %162 = arith.mulf %155, %161 : vector<2x128xf32>
    %163 = arith.truncf %162 : vector<2x128xf32> to vector<2x128xbf16>
    %164 = arith.index_cast %c5_i32 : i32 to index
    %c0_40 = arith.constant 0 : index
    %c0_41 = arith.constant 0 : index
    %165 = vector.load %arg5[%164, %c0_40, %c0_41] : memref<8x2x128xbf16, #tpu.memory_space<vmem>>, vector<1x2x128xbf16>
    %166 = vector.shape_cast %165 : vector<1x2x128xbf16> to vector<2x128xbf16>
    %167 = vector.shape_cast %163 : vector<2x128xbf16> to vector<1x2x128xbf16>
    tpu.vector_store %arg5[%164, %c0_40, %c0_41], %167 {strides = array<i32>} : memref<8x2x128xbf16, #tpu.memory_space<vmem>>, vector<1x2x128xbf16>,
    %c6_i32 = arith.constant 6 : i32
    %168 = arith.index_cast %c6_i32 : i32 to index
    %c0_42 = arith.constant 0 : index
    %c0_43 = arith.constant 0 : index
    %169 = vector.load %arg1[%168, %c0_42, %c0_43] : memref<8x2x512xf32, #tpu.memory_space<vmem>>, vector<1x2x512xf32>
    %170 = vector.shape_cast %169 : vector<1x2x512xf32> to vector<2x512xf32>
    %171 = arith.truncf %162 : vector<2x128xf32> to vector<2x128xbf16>
    %cst_44 = arith.constant dense<0.000000e+00> : vector<2x512xf32>
    %172 = tpu.matmul %171, %3, %cst_44 {dimension_numbers = #tpu.dot_dimension_numbers<[1], [0], [0], [1], [0, 0, 1, 1], [], []>} : vector<2x128xbf16>, vector<128x512xbf16>, vector<2x512xf32> -> vector<2x512xf32>
    %173 = arith.addf %170, %172 : vector<2x512xf32>
    %174 = vector.extract_strided_slice %173 {offsets = [0, 0], sizes = [2, 384], strides = [1, 1]} : vector<2x512xf32> to vector<2x384xf32>
    %175 = arith.negf %174 : vector<2x384xf32>
    %176 = math.exp %175 : vector<2x384xf32>
    %cst_45 = arith.constant 1.000000e+00 : f32
    %177 = vector.broadcast %cst_45 : f32 to vector<2x384xf32>
    %178 = arith.addf %177, %176 : vector<2x384xf32>
    %179 = arith.divf %177, %178 : vector<2x384xf32>
    %180 = vector.extract_strided_slice %179 {offsets = [0, 0], sizes = [2, 128], strides = [1, 1]} : vector<2x384xf32> to vector<2x128xf32>
    %181 = vector.extract_strided_slice %179 {offsets = [0, 128], sizes = [2, 128], strides = [1, 1]} : vector<2x384xf32> to vector<2x128xf32>
    %182 = vector.extract_strided_slice %179 {offsets = [0, 256], sizes = [2, 128], strides = [1, 1]} : vector<2x384xf32> to vector<2x128xf32>
    %183 = vector.extract_strided_slice %173 {offsets = [0, 384], sizes = [2, 128], strides = [1, 1]} : vector<2x512xf32> to vector<2x128xf32>
    %184 = math.tanh %183 : vector<2x128xf32>
    %185 = arith.mulf %181, %160 : vector<2x128xf32>
    %186 = arith.mulf %180, %184 : vector<2x128xf32>
    %187 = arith.addf %185, %186 : vector<2x128xf32>
    %188 = math.tanh %187 : vector<2x128xf32>
    %189 = arith.mulf %182, %188 : vector<2x128xf32>
    %190 = arith.truncf %189 : vector<2x128xf32> to vector<2x128xbf16>
    %191 = arith.index_cast %c6_i32 : i32 to index
    %c0_46 = arith.constant 0 : index
    %c0_47 = arith.constant 0 : index
    %192 = vector.load %arg5[%191, %c0_46, %c0_47] : memref<8x2x128xbf16, #tpu.memory_space<vmem>>, vector<1x2x128xbf16>
    %193 = vector.shape_cast %192 : vector<1x2x128xbf16> to vector<2x128xbf16>
    %194 = vector.shape_cast %190 : vector<2x128xbf16> to vector<1x2x128xbf16>
    tpu.vector_store %arg5[%191, %c0_46, %c0_47], %194 {strides = array<i32>} : memref<8x2x128xbf16, #tpu.memory_space<vmem>>, vector<1x2x128xbf16>,
    %c7_i32 = arith.constant 7 : i32
    %195 = arith.index_cast %c7_i32 : i32 to index
    %c0_48 = arith.constant 0 : index
    %c0_49 = arith.constant 0 : index
    %196 = vector.load %arg1[%195, %c0_48, %c0_49] : memref<8x2x512xf32, #tpu.memory_space<vmem>>, vector<1x2x512xf32>
    %197 = vector.shape_cast %196 : vector<1x2x512xf32> to vector<2x512xf32>
    %198 = arith.truncf %189 : vector<2x128xf32> to vector<2x128xbf16>
    %cst_50 = arith.constant dense<0.000000e+00> : vector<2x512xf32>
    %199 = tpu.matmul %198, %3, %cst_50 {dimension_numbers = #tpu.dot_dimension_numbers<[1], [0], [0], [1], [0, 0, 1, 1], [], []>} : vector<2x128xbf16>, vector<128x512xbf16>, vector<2x512xf32> -> vector<2x512xf32>
    %200 = arith.addf %197, %199 : vector<2x512xf32>
    %201 = vector.extract_strided_slice %200 {offsets = [0, 0], sizes = [2, 384], strides = [1, 1]} : vector<2x512xf32> to vector<2x384xf32>
    %202 = arith.negf %201 : vector<2x384xf32>
    %203 = math.exp %202 : vector<2x384xf32>
    %cst_51 = arith.constant 1.000000e+00 : f32
    %204 = vector.broadcast %cst_51 : f32 to vector<2x384xf32>
    %205 = arith.addf %204, %203 : vector<2x384xf32>
    %206 = arith.divf %204, %205 : vector<2x384xf32>
    %207 = vector.extract_strided_slice %206 {offsets = [0, 0], sizes = [2, 128], strides = [1, 1]} : vector<2x384xf32> to vector<2x128xf32>
    %208 = vector.extract_strided_slice %206 {offsets = [0, 128], sizes = [2, 128], strides = [1, 1]} : vector<2x384xf32> to vector<2x128xf32>
    %209 = vector.extract_strided_slice %206 {offsets = [0, 256], sizes = [2, 128], strides = [1, 1]} : vector<2x384xf32> to vector<2x128xf32>
    %210 = vector.extract_strided_slice %200 {offsets = [0, 384], sizes = [2, 128], strides = [1, 1]} : vector<2x512xf32> to vector<2x128xf32>
    %211 = math.tanh %210 : vector<2x128xf32>
    %212 = arith.mulf %208, %187 : vector<2x128xf32>
    %213 = arith.mulf %207, %211 : vector<2x128xf32>
    %214 = arith.addf %212, %213 : vector<2x128xf32>
    %215 = math.tanh %214 : vector<2x128xf32>
    %216 = arith.mulf %209, %215 : vector<2x128xf32>
    %217 = arith.truncf %216 : vector<2x128xf32> to vector<2x128xbf16>
    %218 = arith.index_cast %c7_i32 : i32 to index
    %c0_52 = arith.constant 0 : index
    %c0_53 = arith.constant 0 : index
    %219 = vector.load %arg5[%218, %c0_52, %c0_53] : memref<8x2x128xbf16, #tpu.memory_space<vmem>>, vector<1x2x128xbf16>
    %220 = vector.shape_cast %219 : vector<1x2x128xbf16> to vector<2x128xbf16>
    %221 = vector.shape_cast %217 : vector<2x128xbf16> to vector<1x2x128xbf16>
    tpu.vector_store %arg5[%218, %c0_52, %c0_53], %221 {strides = array<i32>} : memref<8x2x128xbf16, #tpu.memory_space<vmem>>, vector<1x2x128xbf16>,
    %c8_i32 = arith.constant 8 : i32
    %c0_54 = arith.constant 0 : index
    %c0_55 = arith.constant 0 : index
    %222 = vector.load %arg8[%c0_54, %c0_55] : memref<2x128xf32, #tpu.memory_space<vmem>>, vector<2x128xf32>
    tpu.vector_store %arg8[%c0_54, %c0_55], %216 {strides = array<i32>} : memref<2x128xf32, #tpu.memory_space<vmem>>, vector<2x128xf32>,
    %c0_56 = arith.constant 0 : index
    %c0_57 = arith.constant 0 : index
    %223 = vector.load %arg9[%c0_56, %c0_57] : memref<2x128xf32, #tpu.memory_space<vmem>>, vector<2x128xf32>
    tpu.vector_store %arg9[%c0_56, %c0_57], %214 {strides = array<i32>} : memref<2x128xf32, #tpu.memory_space<vmem>>, vector<2x128xf32>,
    %c0_i32_58 = arith.constant 0 : i32
    %224 = arith.cmpi eq, %arg0, %c0_i32_58 : i32
    %225 = arith.extui %224 : i1 to i32
    %c0_i32_59 = arith.constant 0 : i32
    %226 = arith.cmpi ne, %225, %c0_i32_59 : i32
    scf.if %226 {
      %c0_60 = arith.constant 0 : index
      %c0_61 = arith.constant 0 : index
      %227 = vector.load %arg6[%c0_60, %c0_61] : memref<2x128xf32, #tpu.memory_space<vmem>>, vector<2x128xf32>
      tpu.vector_store %arg6[%c0_60, %c0_61], %216 {strides = array<i32>} : memref<2x128xf32, #tpu.memory_space<vmem>>, vector<2x128xf32>,
      %c0_62 = arith.constant 0 : index
      %c0_63 = arith.constant 0 : index
      %228 = vector.load %arg7[%c0_62, %c0_63] : memref<2x128xf32, #tpu.memory_space<vmem>>, vector<2x128xf32>
      tpu.vector_store %arg7[%c0_62, %c0_63], %214 {strides = array<i32>} : memref<2x128xf32, #tpu.memory_space<vmem>>, vector<2x128xf32>,
    } else {
    }
    return
  }
  func.func @transform_0(%arg0: i32) -> (i32, i32, i32) {
    %c0_i32 = arith.constant 0 : i32
    %c0_i32_0 = arith.constant 0 : i32
    %c0_i32_1 = arith.constant 0 : i32
    return %arg0, %c0_i32, %c0_i32_0 : i32, i32, i32
  }
  func.func @transform_1(%arg0: i32) -> (i32, i32) {
    %c0_i32 = arith.constant 0 : i32
    %c0_i32_0 = arith.constant 0 : i32
    %c0_i32_1 = arith.constant 0 : i32
    return %c0_i32, %c0_i32_0 : i32, i32
  }
  func.func @transform_2(%arg0: i32) -> (i32, i32) {
    %c0_i32 = arith.constant 0 : i32
    %c0_i32_0 = arith.constant 0 : i32
    %c0_i32_1 = arith.constant 0 : i32
    return %c0_i32, %c0_i32_0 : i32, i32
  }
  func.func @transform_3(%arg0: i32) -> (i32, i32) {
    %c0_i32 = arith.constant 0 : i32
    %c0_i32_0 = arith.constant 0 : i32
    %c0_i32_1 = arith.constant 0 : i32
    return %c0_i32, %c0_i32_0 : i32, i32
  }
  func.func @transform_4(%arg0: i32) -> (i32, i32, i32) {
    %c0_i32 = arith.constant 0 : i32
    %c0_i32_0 = arith.constant 0 : i32
    %c0_i32_1 = arith.constant 0 : i32
    return %arg0, %c0_i32, %c0_i32_0 : i32, i32, i32
  }
  func.func @transform_5(%arg0: i32) -> (i32, i32) {
    %c0_i32 = arith.constant 0 : i32
    %c0_i32_0 = arith.constant 0 : i32
    %c0_i32_1 = arith.constant 0 : i32
    return %c0_i32, %c0_i32_0 : i32, i32
  }
  func.func @transform_6(%arg0: i32) -> (i32, i32) {
    %c0_i32 = arith.constant 0 : i32
    %c0_i32_0 = arith.constant 0 : i32
    %c0_i32_1 = arith.constant 0 : i32
    return %c0_i32, %c0_i32_0 : i32, i32
  }
}

</mosaic_0001>

<bundles_post_ra>
// kernel: tpu_custom_call.1
= control target key start
LH: loop header
LB: loop body
LE: loop exit
PB: predicated region body
PF: predicated region fallthrough
CT: control target
= control target key end

     0   :  { %12 = vsyncpa [#allocation5], 0  ;;  %s2134_s0 = inlined_call_operand.hbm [shape: f32[8,2,512], index: 0, kind: input, shape index: {}]   ;;  %s2135_s1 = inlined_call_operand.hbm [shape: bf16[128,512], index: 1, kind: input, shape index: {}]   ;;  %s2136_s2 = inlined_call_operand.vmem [shape: f32[2,128], index: 2, kind: input, shape index: {}]   ;;  %s2137_s3 = inlined_call_operand.vmem [shape: f32[2,128], index: 3, kind: input, shape index: {}]   ;;  %s2138_s4 = inlined_call_operand.hbm [shape: bf16[8,2,128], index: 4, kind: output, shape index: {0}]   ;;  %s2139_s5 = inlined_call_operand.hbm [shape: f32[2,128], index: 5, kind: output, shape index: {1}]   ;;  %s2140_s6 = inlined_call_operand.hbm [shape: f32[2,128], index: 6, kind: output, shape index: {2}]  }
   0x1   :  { %13 = vsyncpa [#allocation8], 0 }
   0x2   :  { %14 = vsyncpa [#allocation6], 0 }
   0x3   :  { %15 = vsyncpa [#allocation11], 0  ;;  %s1636_s21 = smov [#allocation4]   ;;  %s1518_s25 = scalar_lea.hbm %s2134_s0, 1024 }
   0x4   :  { %s21_s22 = sshll.u32 %s1636_s21, 4  ;;  %p1519_p0 = scmp.ne.s32.totalorder %s2134_s0, %s1518_s25  ;;  %s22_s22 = int_to_ptr.vmem [resolvable:$true] %s21_s22 }
   0x5   :  { %p1522_p1 = scmp.lt.u32.totalorder %s1518_s25, %s2134_s0 }
   0x7   :  { %p1524_p2 = pnand %p1522_p1, %p1519_p0 }
   0x9   :  { %1527 = shalt.err (!%p1524_p2)
}
   0xa   :  { %s1528_s30 = scalar_lea.vmem %s22_s22, 1024  ;;  %p1533_p4 = scmp.lt.s32.totalorder %s22_s22, %s22_s22 }
   0xb   :  { %p1529_p3 = scmp.ne.s32.totalorder %s22_s22, %s1528_s30  ;;  %p1534_p5 = scmp.lt.s32.totalorder %s1528_s30, %s1528_s30 }
   0xd   :  { %p1535_p6 = por %p1534_p5, %p1533_p4 }
   0xf   :  { %p1536_p7 = pnand %p1535_p6, %p1529_p3 }
  0x11   :  { %1539 = shalt.err (!%p1536_p7)
}
  0x12   :  { %s1637_s7 = smov 128   ;;  %s1638_s8 = smov 8  }
  0x13   :  { %27 = dma.hbm_to_vmem [thread:$0]  %s2134_s0, 1024, %s22_s22, [#allocation5], %s1637_s7, %s1637_s7, %s1638_s8  }
  0x14   :  { %s1639_s11 = smov [#allocation7]   ;;  %s1540_s15 = scalar_lea.hbm %s2135_s1, 4096 }
  0x15   :  { %s33_s12 = sshll.u32 %s1639_s11, 4  ;;  %p1541_p8 = scmp.ne.s32.totalorder %s2135_s1, %s1540_s15  ;;  %s34_s12 = int_to_ptr.vmem [resolvable:$true] %s33_s12 }
  0x16   :  { %p1544_p9 = scmp.lt.u32.totalorder %s1540_s15, %s2135_s1 }
  0x18   :  { %p1546_p10 = pnand %p1544_p9, %p1541_p8 }
  0x1a   :  { %1549 = shalt.err (!%p1546_p10)
}
  0x1b   :  { %s1550_s20 = scalar_lea.vmem %s34_s12, 4096  ;;  %p1555_p12 = scmp.lt.s32.totalorder %s34_s12, %s34_s12 }
  0x1c   :  { %p1551_p11 = scmp.ne.s32.totalorder %s34_s12, %s1550_s20  ;;  %p1556_p13 = scmp.lt.s32.totalorder %s1550_s20, %s1550_s20 }
  0x1e   :  { %p1557_p0 = por %p1556_p13, %p1555_p12 }
  0x20   :  { %p1558_p1 = pnand %p1557_p0, %p1551_p11 }
  0x22   :  { %1561 = shalt.err (!%p1558_p1)
}
  0x23   :  { %s1640_s0 = smov 256   ;;  %s1641_s21 = smov 16  }
  0x24   :  { %39 = dma.hbm_to_vmem [thread:$0]  %s2135_s1, 4096, %s34_s12, [#allocation8], %s1640_s0, %s1640_s0, %s1641_s21  }
  0x25   :  { %1628 = dma.done.wait [#allocation5], 1024  }
  0x26   :  { %1629 = vsyncadd [#allocation5], 4294966272 }
  0x27   :  { %1630 = dma.done.wait [#allocation8], 4096  }
  0x28   :  { %1631 = vsyncadd [#allocation8], 4294963200  ;;  %v1642_v0 = vmov 0   ;;  %v1710_v1 = vld [vmem:[#allocation7 + $0x4] ss:$16 sps:$4 sm:$0xff]   ;;  %v346_v39 = vlaneseq  ;;  %s1645_s27 = smov [#allocation12]  }
  0x29   :  { %287 = vmatprep.mubr.bf16.mxu0 %v1642_v0  ;;  %328 = vmatprep.mubr.bf16.mxu1 %v1642_v0  ;;  %v1712_v2 = vld [vmem:[#allocation7 + $0xc] ss:$16 sps:$4 sm:$0xff]   ;;  %v1715_v3 = vld [vmem:[#allocation7] ss:$16 sps:$4 sm:$0xff]   ;;  %v1717_v4 = vld [vmem:[#allocation7 + $0x8] ss:$16 sps:$4 sm:$0xff]  }
  0x2a   :  { %255 = vmatprep.subr.bf16.mxu0 %v1710_v1  ;;  %296 = vmatprep.subr.bf16.mxu1 %v1712_v2  ;;  %v1720_v5 = vld [vmem:[#allocation7 + $0x24] ss:$16 sps:$4 sm:$0xff]   ;;  %v1724_v6 = vld [vmem:[#allocation7 + $0x2c] ss:$16 sps:$4 sm:$0xff]   ;;  %v1726_v7 = vld [vmem:[#allocation7 + $0x20] ss:$16 sps:$4 sm:$0xff]  }
  0x2b   :  { %256 = vmatpush1.bf16.msra.mxu0 %v1715_v3  ;;  %297 = vmatpush1.bf16.msra.mxu1 %v1717_v4  ;;  %v1729_v8 = vld [vmem:[#allocation7 + $0x28] ss:$16 sps:$4 sm:$0xff]   ;;  %v1732_v9 = vld [vmem:[#allocation7 + $0x44] ss:$16 sps:$4 sm:$0xff]   ;;  %v1734_v10 = vld [vmem:[#allocation7 + $0x4c] ss:$16 sps:$4 sm:$0xff]  }
  0x2c   :  { %257 = vmatprep.subr.bf16.mxu0 %v1720_v5  ;;  %298 = vmatprep.subr.bf16.mxu1 %v1724_v6  ;;  %v1736_v11 = vld [vmem:[#allocation7 + $0x40] ss:$16 sps:$4 sm:$0xff]   ;;  %v1738_v12 = vld [vmem:[#allocation7 + $0x48] ss:$16 sps:$4 sm:$0xff]   ;;  %v1742_v13 = vld [vmem:[#allocation7 + $0x64] ss:$16 sps:$4 sm:$0xff]  }
  0x2d   :  { %v1746_v14 = vld [vmem:[#allocation7 + $0x6c] ss:$16 sps:$4 sm:$0xff]   ;;  %v1748_v15 = vld [vmem:[#allocation7 + $0x60] ss:$16 sps:$4 sm:$0xff]   ;;  %v1752_v16 = vld [vmem:[#allocation7 + $0x68] ss:$16 sps:$4 sm:$0xff]  }
  0x2e   :  { %v1754_v17 = vld [vmem:[#allocation7 + $0x84] ss:$16 sps:$4 sm:$0xff]   ;;  %v1758_v18 = vld [vmem:[#allocation7 + $0x8c] ss:$16 sps:$4 sm:$0xff]   ;;  %v1760_v19 = vld [vmem:[#allocation7 + $0x80] ss:$16 sps:$4 sm:$0xff]  }
  0x2f   :  { %258 = vmatpush1.bf16.msra.mxu0 %v1726_v7  ;;  %299 = vmatpush1.bf16.msra.mxu1 %v1729_v8  ;;  %v1762_v20 = vld [vmem:[#allocation7 + $0x88] ss:$16 sps:$4 sm:$0xff]   ;;  %v1766_v21 = vld [vmem:[#allocation7 + $0xa4] ss:$16 sps:$4 sm:$0xff]   ;;  %v1770_v22 = vld [vmem:[#allocation7 + $0xac] ss:$16 sps:$4 sm:$0xff]  }
  0x30   :  { %259 = vmatprep.subr.bf16.mxu0 %v1732_v9  ;;  %300 = vmatprep.subr.bf16.mxu1 %v1734_v10  ;;  %v1774_v23 = vld [vmem:[#allocation7 + $0xa0] ss:$16 sps:$4 sm:$0xff]   ;;  %v1776_v24 = vld [vmem:[#allocation7 + $0xa8] ss:$16 sps:$4 sm:$0xff]   ;;  %v1780_v25 = vld [vmem:[#allocation7 + $0xc4] ss:$16 sps:$4 sm:$0xff]  }
  0x31   :  { %v1782_v26 = vld [vmem:[#allocation7 + $0xcc] ss:$16 sps:$4 sm:$0xff]   ;;  %v1789_v28 = vld [vmem:[#allocation7 + $0xc0] ss:$16 sps:$4 sm:$0xff]   ;;  %v1791_v29 = vld [vmem:[#allocation7 + $0xc8] ss:$16 sps:$4 sm:$0xff]  }
  0x32   :  { %v55_v27 = vld [vmem:[%s2136_s2] sm:$0x3]  ;;  %v1795_v30 = vld [vmem:[#allocation7 + $0xe4] ss:$16 sps:$4 sm:$0xff]   ;;  %v1801_v32 = vld [vmem:[#allocation7 + $0xe0] ss:$16 sps:$4 sm:$0xff]  }
  0x33   :  { %260 = vmatpush1.bf16.msra.mxu0 %v1736_v11  ;;  %301 = vmatpush1.bf16.msra.mxu1 %v1738_v12  ;;  %56 = vst [vmem:[#allocation2] sm:$0x3] %v55_v27  ;;  %v1797_v31 = vld [vmem:[#allocation7 + $0xec] ss:$16 sps:$4 sm:$0xff]   ;;  %v1803_v33 = vld [vmem:[#allocation7 + $0xe8] ss:$16 sps:$4 sm:$0xff]  }
  0x34   :  { %261 = vmatprep.subr.bf16.mxu0 %v1742_v13  ;;  %302 = vmatprep.subr.bf16.mxu1 %v1746_v14  ;;  %v57_v36 = vld [vmem:[%s2137_s3] sm:$0x3]  ;;  %v1643_v37 = vmov 1983009808   ;;  %v347_v41 = vshrl.u32 %v346_v39, 7  ;;  %v93_v55 = vld [vmem:[#allocation4] sm:$0xff] }
  0x35   :  { %58 = vst [vmem:[#allocation3] sm:$0x3] %v57_v36  ;;  %v344_v38 = vunpack.c.l.s4 %v1643_v37  ;;  %s1644_s3 = smov [#allocation10]   ;;  %s1327_s28 = sshll.u32 %s1645_s27, 4  ;;  %s2082_s28 = int_to_ptr.vmem [resolvable:$true] %s1327_s28 }
  0x36   :  { %s1317_s26 = sshll.u32 %s1644_s3, 4  ;;  %s1646_s29 = smov [#allocation9]   ;;  %s1318_s26 = int_to_ptr.vmem [resolvable:$true] %s1317_s26 }
  0x37   :  { %262 = vmatpush1.bf16.msra.mxu0 %v1748_v15  ;;  %303 = vmatpush1.bf16.msra.mxu1 %v1752_v16  ;;  %v345_v40 = vunpack.c.0.s8 %v344_v38  ;;  %s1304_s30 = sshll.u32 %s1646_s29, 4  ;;  %s1562_s7 = scalar_lea.vmem %s1318_s26, 32  ;;  %s2084_s30 = int_to_ptr.vmem [resolvable:$true] %s1304_s30 }
  0x38   :  { %263 = vmatprep.subr.bf16.mxu0 %v1754_v17  ;;  %304 = vmatprep.subr.bf16.mxu1 %v1758_v18  ;;  %p1563_p2 = scmp.ne.s32.totalorder %s1318_s26, %s1562_s7  ;;  %p1567_p3 = scmp.lt.s32.totalorder %s1318_s26, %s1318_s26 }
  0x39   :  { %v1848_v44 = vsub.s32 %v345_v40, %v347_v41  ;;  %p1568_p4 = scmp.lt.s32.totalorder %s1562_s7, %s1562_s7 }
  0x3a   :  { %v91_v34 = vld [vmem:[#allocation2] sm:$0x3] }
  0x3b   :  { %264 = vmatpush1.bf16.msra.mxu0 %v1760_v19  ;;  %305 = vmatpush1.bf16.msra.mxu1 %v1762_v20  ;;  %v94_v35 = vpack.c.bf16 %v91_v34, %v91_v34  ;;  %p1569_p5 = por %p1568_p4, %p1567_p3 }
  0x3c   :  { %265 = vmatprep.subr.bf16.mxu0 %v1766_v21  ;;  %306 = vmatprep.subr.bf16.mxu1 %v1770_v22  ;;  %v92_v63 = vld [vmem:[#allocation3] sm:$0x3] }
  0x3d   :  { %p1570_p6 = pnand %p1569_p5, %p1563_p2 }
  0x3f   :  { %266 = vmatpush1.bf16.msra.mxu0 %v1774_v23  ;;  %307 = vmatpush1.bf16.msra.mxu1 %v1776_v24 }
  0x40   :  { %267 = vmatprep.subr.bf16.mxu0 %v1780_v25  ;;  %308 = vmatprep.subr.bf16.mxu1 %v1782_v26 }
  0x43   :  { %268 = vmatpush1.bf16.msra.mxu0 %v1789_v28  ;;  %309 = vmatpush1.bf16.msra.mxu1 %v1791_v29 }
  0x44   :  { %269 = vmatprep.subr.bf16.mxu0 %v1795_v30  ;;  %310 = vmatprep.subr.bf16.mxu1 %v1797_v31 }
  0x47   :  { %270 = vmatpush1.bf16.msra.mxu0 %v1801_v32  ;;  %311 = vmatpush1.bf16.msra.mxu1 %v1803_v33 }
  0x48   :  { %384 = vmatprep.subr.bf16.mxu0 %v1710_v1  ;;  %425 = vmatprep.subr.bf16.mxu1 %v1712_v2 }
  0x4a   :  { %288 = vmatmul.mubr.bf16.vlgmr.msra.gmra.mrb[0].mxu0 %v94_v35  ;;  %329 = vmatmul.mubr.bf16.vlgmr.msra.gmra.mrb[0].mxu1 %v94_v35 }
  0x4b   :  { %385 = vmatpush1.bf16.msra.mxu0 %v1715_v3  ;;  %426 = vmatpush1.bf16.msra.mxu1 %v1717_v4 }
  0x4c   :  { %386 = vmatprep.subr.bf16.mxu0 %v1720_v5  ;;  %427 = vmatprep.subr.bf16.mxu1 %v1724_v6 }
  0x4d   :  { %416 = vmatprep.mubr.bf16.mxu0 %v1642_v0  ;;  %457 = vmatprep.mubr.bf16.mxu1 %v1642_v0 }
  0x4f   :  { %387 = vmatpush1.bf16.msra.mxu0 %v1726_v7  ;;  %428 = vmatpush1.bf16.msra.mxu1 %v1729_v8 }
  0x50   :  { %388 = vmatprep.subr.bf16.mxu0 %v1732_v9  ;;  %429 = vmatprep.subr.bf16.mxu1 %v1734_v10 }
  0x53   :  { %389 = vmatpush1.bf16.msra.mxu0 %v1736_v11  ;;  %430 = vmatpush1.bf16.msra.mxu1 %v1738_v12 }
  0x54   :  { %390 = vmatprep.subr.bf16.mxu0 %v1742_v13  ;;  %431 = vmatprep.subr.bf16.mxu1 %v1746_v14 }
  0x57   :  { %391 = vmatpush1.bf16.msra.mxu0 %v1748_v15  ;;  %432 = vmatpush1.bf16.msra.mxu1 %v1752_v16 }
  0x58   :  { %392 = vmatprep.subr.bf16.mxu0 %v1754_v17  ;;  %433 = vmatprep.subr.bf16.mxu1 %v1758_v18 }
  0x5b   :  { %393 = vmatpush1.bf16.msra.mxu0 %v1760_v19  ;;  %434 = vmatpush1.bf16.msra.mxu1 %v1762_v20 }
  0x5c   :  { %394 = vmatprep.subr.bf16.mxu0 %v1766_v21  ;;  %435 = vmatprep.subr.bf16.mxu1 %v1770_v22 }
  0x5f   :  { %395 = vmatpush1.bf16.msra.mxu0 %v1774_v23  ;;  %436 = vmatpush1.bf16.msra.mxu1 %v1776_v24 }
  0x60   :  { %396 = vmatprep.subr.bf16.mxu0 %v1780_v25  ;;  %437 = vmatprep.subr.bf16.mxu1 %v1782_v26 }
  0x63   :  { %397 = vmatpush1.bf16.msra.mxu0 %v1789_v28  ;;  %438 = vmatpush1.bf16.msra.mxu1 %v1791_v29 }
  0x64   :  { %398 = vmatprep.subr.bf16.mxu0 %v1795_v30  ;;  %439 = vmatprep.subr.bf16.mxu1 %v1797_v31 }
  0x67   :  { %399 = vmatpush1.bf16.msra.mxu0 %v1801_v32  ;;  %440 = vmatpush1.bf16.msra.mxu1 %v1803_v33 }
  0x68   :  { %514 = vmatprep.subr.bf16.mxu0 %v1710_v1  ;;  %555 = vmatprep.subr.bf16.mxu1 %v1712_v2 }
 0x11d   :  { %v289_v42 = vpop.f32.mrb[0].mxu0  ;;  %v330_v43 = vpop.f32.mrb[0].mxu1 }
 0x11e   :  { %v291_v45 = vpop.f32.mrb[1].mxu0  ;;  %v332_v46 = vpop.f32.mrb[1].mxu1 }
 0x11f   :  { %v341_v47 = vcombine.low %v289_v42, %v291_v45  ;;  %v342_v48 = vcombine.low %v330_v43, %v332_v46  ;;  %v293_v49 = vpop.f32.mrb[2].mxu0  ;;  %v334_v50 = vpop.f32.mrb[2].mxu1 }
 0x120   :  { %v294_v51 = vpop.f32.mrb[3].mxu0  ;;  %v335_v52 = vpop.f32.mrb[3].mxu1 }
 0x121   :  { %v349_v53 = vrot.slane %v341_v47, %v1848_v44  ;;  %v356_v54 = vrot.slane %v342_v48, %v1848_v44 }
 0x123   :  { %v357_v56 = vcombine.low %v349_v53, %v356_v54 }
 0x125   :  { %v359_v57 = vadd.f32 %v357_v56, %v93_v55  ;;  %v383_v55 = vld [vmem:[#allocation4 + $0x8] sm:$0xff] }
 0x127   :  { %v1376_v58 = vmul.f32 -1.442695, %v359_v57  ;;  %v367_v61 = vrot.slane %v359_v57, 6 }
 0x129   :  { %1444 = vpow2.f32 %v1376_v58 }
 0x133   :  { %v1445_v59 = vpop.eup %1444 }
 0x134   :  { %v363_v60 = vadd.f32 1.0, %v1445_v59 }
 0x136   :  { %1446 = vrcp.f32 %v363_v60 }
 0x137   :  { %1448 = vtanh.f32 %v367_v61 }
 0x140   :  { %v1447_v62 = vpop.eup %1446 }
 0x141   :  { %v371_v27 = vrot.slane %v1447_v62, 2  ;;  %v1449_v34 = vpop.eup %1448  ;;  %v377_v38 = vrot.slane %v1447_v62, 4 }
 0x142   :  { %v374_v35 = vmul.f32 %v1449_v34, %v1447_v62 }
 0x143   :  { %v373_v36 = vmul.f32 %v371_v27, %v92_v63 }
 0x145   :  { %v1852_v37 = vadd.f32 %v374_v35, %v373_v36 }
 0x147   :  { %1450 = vtanh.f32 %v1852_v37 }
 0x151   :  { %v1451_v39 = vpop.eup %1450 }
 0x152   :  { %v379_v40 = vmul.f32 %v1451_v39, %v377_v38 }
 0x154   :  { %v380_v41 = vpack.c.bf16 %v379_v40, %v379_v40 }
 0x156   :  { %381 = vst [vmem:[#allocation9] sm:$0x1] %v380_v41  ;;  %417 = vmatmul.mubr.bf16.vlgmr.msra.gmra.mrb[4].mxu0 %v380_v41  ;;  %458 = vmatmul.mubr.bf16.vlgmr.msra.gmra.mrb[4].mxu1 %v380_v41 }
 0x157   :  { %515 = vmatpush1.bf16.msra.mxu0 %v1715_v3  ;;  %556 = vmatpush1.bf16.msra.mxu1 %v1717_v4 }
 0x158   :  { %516 = vmatprep.subr.bf16.mxu0 %v1720_v5  ;;  %557 = vmatprep.subr.bf16.mxu1 %v1724_v6 }
 0x159   :  { %546 = vmatprep.mubr.bf16.mxu0 %v1642_v0  ;;  %587 = vmatprep.mubr.bf16.mxu1 %v1642_v0 }
 0x15b   :  { %517 = vmatpush1.bf16.msra.mxu0 %v1726_v7  ;;  %558 = vmatpush1.bf16.msra.mxu1 %v1729_v8 }
 0x15c   :  { %518 = vmatprep.subr.bf16.mxu0 %v1732_v9  ;;  %559 = vmatprep.subr.bf16.mxu1 %v1734_v10 }
 0x15f   :  { %519 = vmatpush1.bf16.msra.mxu0 %v1736_v11  ;;  %560 = vmatpush1.bf16.msra.mxu1 %v1738_v12 }
 0x160   :  { %520 = vmatprep.subr.bf16.mxu0 %v1742_v13  ;;  %561 = vmatprep.subr.bf16.mxu1 %v1746_v14 }
 0x163   :  { %521 = vmatpush1.bf16.msra.mxu0 %v1748_v15  ;;  %562 = vmatpush1.bf16.msra.mxu1 %v1752_v16 }
 0x164   :  { %522 = vmatprep.subr.bf16.mxu0 %v1754_v17  ;;  %563 = vmatprep.subr.bf16.mxu1 %v1758_v18 }
 0x167   :  { %523 = vmatpush1.bf16.msra.mxu0 %v1760_v19  ;;  %564 = vmatpush1.bf16.msra.mxu1 %v1762_v20 }
 0x168   :  { %524 = vmatprep.subr.bf16.mxu0 %v1766_v21  ;;  %565 = vmatprep.subr.bf16.mxu1 %v1770_v22 }
 0x16b   :  { %525 = vmatpush1.bf16.msra.mxu0 %v1774_v23  ;;  %566 = vmatpush1.bf16.msra.mxu1 %v1776_v24 }
 0x16c   :  { %526 = vmatprep.subr.bf16.mxu0 %v1780_v25  ;;  %567 = vmatprep.subr.bf16.mxu1 %v1782_v26 }
 0x16f   :  { %527 = vmatpush1.bf16.msra.mxu0 %v1789_v28  ;;  %568 = vmatpush1.bf16.msra.mxu1 %v1791_v29 }
 0x170   :  { %528 = vmatprep.subr.bf16.mxu0 %v1795_v30  ;;  %569 = vmatprep.subr.bf16.mxu1 %v1797_v31 }
 0x173   :  { %529 = vmatpush1.bf16.msra.mxu0 %v1801_v32  ;;  %570 = vmatpush1.bf16.msra.mxu1 %v1803_v33 }
 0x174   :  { %644 = vmatprep.subr.bf16.mxu0 %v1710_v1  ;;  %685 = vmatprep.subr.bf16.mxu1 %v1712_v2 }
 0x229   :  { %v418_v42 = vpop.f32.mrb[4].mxu0  ;;  %v459_v43 = vpop.f32.mrb[4].mxu1 }
 0x22a   :  { %v420_v45 = vpop.f32.mrb[5].mxu0  ;;  %v461_v46 = vpop.f32.mrb[5].mxu1 }
 0x22b   :  { %v470_v47 = vcombine.low %v418_v42, %v420_v45  ;;  %v471_v48 = vcombine.low %v459_v43, %v461_v46  ;;  %v422_v49 = vpop.f32.mrb[6].mxu0  ;;  %v463_v50 = vpop.f32.mrb[6].mxu1 }
 0x22c   :  { %v423_v51 = vpop.f32.mrb[7].mxu0  ;;  %v464_v52 = vpop.f32.mrb[7].mxu1 }
 0x22d   :  { %v478_v53 = vrot.slane %v470_v47, %v1848_v44  ;;  %v485_v54 = vrot.slane %v471_v48, %v1848_v44 }
 0x22f   :  { %v486_v56 = vcombine.low %v478_v53, %v485_v54  ;;  %v513_v54 = vld [vmem:[#allocation4 + $0x10] sm:$0xff] }
 0x231   :  { %v488_v57 = vadd.f32 %v486_v56, %v383_v55 }
 0x233   :  { %v1377_v58 = vmul.f32 -1.442695, %v488_v57  ;;  %v496_v61 = vrot.slane %v488_v57, 6 }
 0x235   :  { %1452 = vpow2.f32 %v1377_v58 }
 0x23f   :  { %v1453_v59 = vpop.eup %1452 }
 0x240   :  { %v492_v60 = vadd.f32 1.0, %v1453_v59 }
 0x242   :  { %1454 = vrcp.f32 %v492_v60 }
 0x243   :  { %1456 = vtanh.f32 %v496_v61 }
 0x24c   :  { %v1455_v62 = vpop.eup %1454 }
 0x24d   :  { %v500_v63 = vrot.slane %v1455_v62, 2  ;;  %v1457_v27 = vpop.eup %1456  ;;  %v506_v38 = vrot.slane %v1455_v62, 4 }
 0x24e   :  { %v503_v34 = vmul.f32 %v1457_v27, %v1455_v62 }
 0x24f   :  { %v502_v35 = vmul.f32 %v500_v63, %v1852_v37 }
 0x251   :  { %v1892_v36 = vadd.f32 %v503_v34, %v502_v35 }
 0x253   :  { %1458 = vtanh.f32 %v1892_v36 }
 0x25d   :  { %v1459_v39 = vpop.eup %1458 }
 0x25e   :  { %v508_v40 = vmul.f32 %v1459_v39, %v506_v38 }
 0x260   :  { %v509_v41 = vpack.c.bf16 %v508_v40, %v508_v40 }
 0x262   :  { %511 = vst [vmem:[#allocation9 + $0x1] sm:$0x1] %v509_v41  ;;  %547 = vmatmul.mubr.bf16.vlgmr.msra.gmra.mrb[8].mxu0 %v509_v41  ;;  %588 = vmatmul.mubr.bf16.vlgmr.msra.gmra.mrb[8].mxu1 %v509_v41 }
 0x263   :  { %645 = vmatpush1.bf16.msra.mxu0 %v1715_v3  ;;  %686 = vmatpush1.bf16.msra.mxu1 %v1717_v4 }
 0x264   :  { %646 = vmatprep.subr.bf16.mxu0 %v1720_v5  ;;  %687 = vmatprep.subr.bf16.mxu1 %v1724_v6 }
 0x265   :  { %676 = vmatprep.mubr.bf16.mxu0 %v1642_v0  ;;  %717 = vmatprep.mubr.bf16.mxu1 %v1642_v0 }
 0x267   :  { %647 = vmatpush1.bf16.msra.mxu0 %v1726_v7  ;;  %688 = vmatpush1.bf16.msra.mxu1 %v1729_v8 }
 0x268   :  { %648 = vmatprep.subr.bf16.mxu0 %v1732_v9  ;;  %689 = vmatprep.subr.bf16.mxu1 %v1734_v10 }
 0x26b   :  { %649 = vmatpush1.bf16.msra.mxu0 %v1736_v11  ;;  %690 = vmatpush1.bf16.msra.mxu1 %v1738_v12 }
 0x26c   :  { %650 = vmatprep.subr.bf16.mxu0 %v1742_v13  ;;  %691 = vmatprep.subr.bf16.mxu1 %v1746_v14 }
 0x26f   :  { %651 = vmatpush1.bf16.msra.mxu0 %v1748_v15  ;;  %692 = vmatpush1.bf16.msra.mxu1 %v1752_v16 }
 0x270   :  { %652 = vmatprep.subr.bf16.mxu0 %v1754_v17  ;;  %693 = vmatprep.subr.bf16.mxu1 %v1758_v18 }
 0x273   :  { %653 = vmatpush1.bf16.msra.mxu0 %v1760_v19  ;;  %694 = vmatpush1.bf16.msra.mxu1 %v1762_v20 }
 0x274   :  { %654 = vmatprep.subr.bf16.mxu0 %v1766_v21  ;;  %695 = vmatprep.subr.bf16.mxu1 %v1770_v22 }
 0x277   :  { %655 = vmatpush1.bf16.msra.mxu0 %v1774_v23  ;;  %696 = vmatpush1.bf16.msra.mxu1 %v1776_v24 }
 0x278   :  { %656 = vmatprep.subr.bf16.mxu0 %v1780_v25  ;;  %697 = vmatprep.subr.bf16.mxu1 %v1782_v26 }
 0x27b   :  { %657 = vmatpush1.bf16.msra.mxu0 %v1789_v28  ;;  %698 = vmatpush1.bf16.msra.mxu1 %v1791_v29 }
 0x27c   :  { %658 = vmatprep.subr.bf16.mxu0 %v1795_v30  ;;  %699 = vmatprep.subr.bf16.mxu1 %v1797_v31 }
 0x27f   :  { %659 = vmatpush1.bf16.msra.mxu0 %v1801_v32  ;;  %700 = vmatpush1.bf16.msra.mxu1 %v1803_v33 }
 0x280   :  { %774 = vmatprep.subr.bf16.mxu0 %v1710_v1  ;;  %815 = vmatprep.subr.bf16.mxu1 %v1712_v2 }
 0x335   :  { %v548_v37 = vpop.f32.mrb[8].mxu0  ;;  %v589_v42 = vpop.f32.mrb[8].mxu1 }
 0x336   :  { %v550_v43 = vpop.f32.mrb[9].mxu0  ;;  %v591_v45 = vpop.f32.mrb[9].mxu1 }
 0x337   :  { %v600_v46 = vcombine.low %v548_v37, %v550_v43  ;;  %v601_v47 = vcombine.low %v589_v42, %v591_v45  ;;  %v552_v48 = vpop.f32.mrb[10].mxu0  ;;  %v593_v49 = vpop.f32.mrb[10].mxu1 }
 0x338   :  { %v553_v50 = vpop.f32.mrb[11].mxu0  ;;  %v594_v51 = vpop.f32.mrb[11].mxu1 }
 0x339   :  { %v608_v52 = vrot.slane %v600_v46, %v1848_v44  ;;  %v615_v53 = vrot.slane %v601_v47, %v1848_v44 }
 0x33b   :  { %v616_v55 = vcombine.low %v608_v52, %v615_v53  ;;  %v643_v53 = vld [vmem:[#allocation4 + $0x18] sm:$0xff] }
 0x33d   :  { %v618_v56 = vadd.f32 %v616_v55, %v513_v54 }
 0x33f   :  { %v1378_v57 = vmul.f32 -1.442695, %v618_v56  ;;  %v626_v60 = vrot.slane %v618_v56, 6 }
 0x341   :  { %1460 = vpow2.f32 %v1378_v57 }
 0x34b   :  { %v1461_v58 = vpop.eup %1460 }
 0x34c   :  { %v622_v59 = vadd.f32 1.0, %v1461_v58 }
 0x34e   :  { %1462 = vrcp.f32 %v622_v59 }
 0x34f   :  { %1464 = vtanh.f32 %v626_v60 }
 0x358   :  { %v1463_v61 = vpop.eup %1462 }
 0x359   :  { %v630_v62 = vrot.slane %v1463_v61, 2  ;;  %v1465_v63 = vpop.eup %1464  ;;  %v636_v38 = vrot.slane %v1463_v61, 4 }
 0x35a   :  { %v633_v27 = vmul.f32 %v1465_v63, %v1463_v61 }
 0x35b   :  { %v632_v34 = vmul.f32 %v630_v62, %v1892_v36 }
 0x35d   :  { %v1932_v35 = vadd.f32 %v633_v27, %v632_v34 }
 0x35f   :  { %1466 = vtanh.f32 %v1932_v35 }
 0x369   :  { %v1467_v39 = vpop.eup %1466 }
 0x36a   :  { %v638_v40 = vmul.f32 %v1467_v39, %v636_v38 }
 0x36c   :  { %v639_v41 = vpack.c.bf16 %v638_v40, %v638_v40 }
 0x36e   :  { %641 = vst [vmem:[#allocation9 + $0x2] sm:$0x1] %v639_v41  ;;  %677 = vmatmul.mubr.bf16.vlgmr.msra.gmra.mrb[12].mxu0 %v639_v41  ;;  %718 = vmatmul.mubr.bf16.vlgmr.msra.gmra.mrb[12].mxu1 %v639_v41 }
 0x36f   :  { %775 = vmatpush1.bf16.msra.mxu0 %v1715_v3  ;;  %816 = vmatpush1.bf16.msra.mxu1 %v1717_v4 }
 0x370   :  { %776 = vmatprep.subr.bf16.mxu0 %v1720_v5  ;;  %817 = vmatprep.subr.bf16.mxu1 %v1724_v6 }
 0x371   :  { %806 = vmatprep.mubr.bf16.mxu0 %v1642_v0  ;;  %847 = vmatprep.mubr.bf16.mxu1 %v1642_v0 }
 0x373   :  { %777 = vmatpush1.bf16.msra.mxu0 %v1726_v7  ;;  %818 = vmatpush1.bf16.msra.mxu1 %v1729_v8 }
 0x374   :  { %778 = vmatprep.subr.bf16.mxu0 %v1732_v9  ;;  %819 = vmatprep.subr.bf16.mxu1 %v1734_v10 }
 0x377   :  { %779 = vmatpush1.bf16.msra.mxu0 %v1736_v11  ;;  %820 = vmatpush1.bf16.msra.mxu1 %v1738_v12 }
 0x378   :  { %780 = vmatprep.subr.bf16.mxu0 %v1742_v13  ;;  %821 = vmatprep.subr.bf16.mxu1 %v1746_v14 }
 0x37b   :  { %781 = vmatpush1.bf16.msra.mxu0 %v1748_v15  ;;  %822 = vmatpush1.bf16.msra.mxu1 %v1752_v16 }
 0x37c   :  { %782 = vmatprep.subr.bf16.mxu0 %v1754_v17  ;;  %823 = vmatprep.subr.bf16.mxu1 %v1758_v18 }
 0x37f   :  { %783 = vmatpush1.bf16.msra.mxu0 %v1760_v19  ;;  %824 = vmatpush1.bf16.msra.mxu1 %v1762_v20 }
 0x380   :  { %784 = vmatprep.subr.bf16.mxu0 %v1766_v21  ;;  %825 = vmatprep.subr.bf16.mxu1 %v1770_v22 }
 0x383   :  { %785 = vmatpush1.bf16.msra.mxu0 %v1774_v23  ;;  %826 = vmatpush1.bf16.msra.mxu1 %v1776_v24 }
 0x384   :  { %786 = vmatprep.subr.bf16.mxu0 %v1780_v25  ;;  %827 = vmatprep.subr.bf16.mxu1 %v1782_v26 }
 0x387   :  { %787 = vmatpush1.bf16.msra.mxu0 %v1789_v28  ;;  %828 = vmatpush1.bf16.msra.mxu1 %v1791_v29 }
 0x388   :  { %788 = vmatprep.subr.bf16.mxu0 %v1795_v30  ;;  %829 = vmatprep.subr.bf16.mxu1 %v1797_v31 }
 0x38b   :  { %789 = vmatpush1.bf16.msra.mxu0 %v1801_v32  ;;  %830 = vmatpush1.bf16.msra.mxu1 %v1803_v33 }
 0x38c   :  { %904 = vmatprep.subr.bf16.mxu0 %v1710_v1  ;;  %945 = vmatprep.subr.bf16.mxu1 %v1712_v2 }
 0x441   :  { %v678_v36 = vpop.f32.mrb[12].mxu0  ;;  %v719_v37 = vpop.f32.mrb[12].mxu1 }
 0x442   :  { %v680_v42 = vpop.f32.mrb[13].mxu0  ;;  %v721_v43 = vpop.f32.mrb[13].mxu1 }
 0x443   :  { %v730_v45 = vcombine.low %v678_v36, %v680_v42  ;;  %v731_v46 = vcombine.low %v719_v37, %v721_v43  ;;  %v682_v47 = vpop.f32.mrb[14].mxu0  ;;  %v723_v48 = vpop.f32.mrb[14].mxu1 }
 0x444   :  { %v683_v49 = vpop.f32.mrb[15].mxu0  ;;  %v724_v50 = vpop.f32.mrb[15].mxu1 }
 0x445   :  { %v738_v51 = vrot.slane %v730_v45, %v1848_v44  ;;  %v745_v52 = vrot.slane %v731_v46, %v1848_v44 }
 0x447   :  { %v746_v54 = vcombine.low %v738_v51, %v745_v52  ;;  %v773_v52 = vld [vmem:[#allocation4 + $0x20] sm:$0xff] }
 0x449   :  { %v748_v55 = vadd.f32 %v746_v54, %v643_v53 }
 0x44b   :  { %v1379_v56 = vmul.f32 -1.442695, %v748_v55  ;;  %v756_v59 = vrot.slane %v748_v55, 6 }
 0x44d   :  { %1468 = vpow2.f32 %v1379_v56 }
 0x457   :  { %v1469_v57 = vpop.eup %1468 }
 0x458   :  { %v752_v58 = vadd.f32 1.0, %v1469_v57 }
 0x45a   :  { %1470 = vrcp.f32 %v752_v58 }
 0x45b   :  { %1472 = vtanh.f32 %v756_v59 }
 0x464   :  { %v1471_v60 = vpop.eup %1470 }
 0x465   :  { %v760_v61 = vrot.slane %v1471_v60, 2  ;;  %v1473_v62 = vpop.eup %1472  ;;  %v766_v38 = vrot.slane %v1471_v60, 4 }
 0x466   :  { %v763_v63 = vmul.f32 %v1473_v62, %v1471_v60 }
 0x467   :  { %v762_v27 = vmul.f32 %v760_v61, %v1932_v35 }
 0x469   :  { %v1972_v34 = vadd.f32 %v763_v63, %v762_v27 }
 0x46b   :  { %1474 = vtanh.f32 %v1972_v34 }
 0x475   :  { %v1475_v39 = vpop.eup %1474 }
 0x476   :  { %v768_v40 = vmul.f32 %v1475_v39, %v766_v38 }
 0x478   :  { %v769_v41 = vpack.c.bf16 %v768_v40, %v768_v40 }
 0x47a   :  { %771 = vst [vmem:[#allocation9 + $0x3] sm:$0x1] %v769_v41  ;;  %807 = vmatmul.mubr.bf16.vlgmr.msra.gmra.mrb[16].mxu0 %v769_v41  ;;  %848 = vmatmul.mubr.bf16.vlgmr.msra.gmra.mrb[16].mxu1 %v769_v41 }
 0x47b   :  { %905 = vmatpush1.bf16.msra.mxu0 %v1715_v3  ;;  %946 = vmatpush1.bf16.msra.mxu1 %v1717_v4 }
 0x47c   :  { %906 = vmatprep.subr.bf16.mxu0 %v1720_v5  ;;  %947 = vmatprep.subr.bf16.mxu1 %v1724_v6 }
 0x47d   :  { %936 = vmatprep.mubr.bf16.mxu0 %v1642_v0  ;;  %977 = vmatprep.mubr.bf16.mxu1 %v1642_v0 }
 0x47f   :  { %907 = vmatpush1.bf16.msra.mxu0 %v1726_v7  ;;  %948 = vmatpush1.bf16.msra.mxu1 %v1729_v8 }
 0x480   :  { %908 = vmatprep.subr.bf16.mxu0 %v1732_v9  ;;  %949 = vmatprep.subr.bf16.mxu1 %v1734_v10 }
 0x483   :  { %909 = vmatpush1.bf16.msra.mxu0 %v1736_v11  ;;  %950 = vmatpush1.bf16.msra.mxu1 %v1738_v12 }
 0x484   :  { %910 = vmatprep.subr.bf16.mxu0 %v1742_v13  ;;  %951 = vmatprep.subr.bf16.mxu1 %v1746_v14 }
 0x487   :  { %911 = vmatpush1.bf16.msra.mxu0 %v1748_v15  ;;  %952 = vmatpush1.bf16.msra.mxu1 %v1752_v16 }
 0x488   :  { %912 = vmatprep.subr.bf16.mxu0 %v1754_v17  ;;  %953 = vmatprep.subr.bf16.mxu1 %v1758_v18 }
 0x48b   :  { %913 = vmatpush1.bf16.msra.mxu0 %v1760_v19  ;;  %954 = vmatpush1.bf16.msra.mxu1 %v1762_v20 }
 0x48c   :  { %914 = vmatprep.subr.bf16.mxu0 %v1766_v21  ;;  %955 = vmatprep.subr.bf16.mxu1 %v1770_v22 }
 0x48f   :  { %915 = vmatpush1.bf16.msra.mxu0 %v1774_v23  ;;  %956 = vmatpush1.bf16.msra.mxu1 %v1776_v24 }
 0x490   :  { %916 = vmatprep.subr.bf16.mxu0 %v1780_v25  ;;  %957 = vmatprep.subr.bf16.mxu1 %v1782_v26 }
 0x493   :  { %917 = vmatpush1.bf16.msra.mxu0 %v1789_v28  ;;  %958 = vmatpush1.bf16.msra.mxu1 %v1791_v29 }
 0x494   :  { %918 = vmatprep.subr.bf16.mxu0 %v1795_v30  ;;  %959 = vmatprep.subr.bf16.mxu1 %v1797_v31 }
 0x497   :  { %919 = vmatpush1.bf16.msra.mxu0 %v1801_v32  ;;  %960 = vmatpush1.bf16.msra.mxu1 %v1803_v33 }
 0x498   :  { %1034 = vmatprep.subr.bf16.mxu0 %v1710_v1  ;;  %1075 = vmatprep.subr.bf16.mxu1 %v1712_v2 }
 0x54d   :  { %v808_v35 = vpop.f32.mrb[16].mxu0  ;;  %v849_v36 = vpop.f32.mrb[16].mxu1 }
 0x54e   :  { %v810_v37 = vpop.f32.mrb[17].mxu0  ;;  %v851_v42 = vpop.f32.mrb[17].mxu1 }
 0x54f   :  { %v860_v43 = vcombine.low %v808_v35, %v810_v37  ;;  %v861_v45 = vcombine.low %v849_v36, %v851_v42  ;;  %v812_v46 = vpop.f32.mrb[18].mxu0  ;;  %v853_v47 = vpop.f32.mrb[18].mxu1  ;;  %v903_v36 = vld [vmem:[#allocation4 + $0x28] sm:$0xff] }
 0x550   :  { %v813_v48 = vpop.f32.mrb[19].mxu0  ;;  %v854_v49 = vpop.f32.mrb[19].mxu1 }
 0x551   :  { %v868_v50 = vrot.slane %v860_v43, %v1848_v44  ;;  %v875_v51 = vrot.slane %v861_v45, %v1848_v44 }
 0x553   :  { %v876_v53 = vcombine.low %v868_v50, %v875_v51 }
 0x555   :  { %v878_v54 = vadd.f32 %v876_v53, %v773_v52 }
 0x557   :  { %v1380_v55 = vmul.f32 -1.442695, %v878_v54  ;;  %v886_v58 = vrot.slane %v878_v54, 6 }
 0x559   :  { %1476 = vpow2.f32 %v1380_v55 }
 0x563   :  { %v1477_v56 = vpop.eup %1476 }
 0x564   :  { %v882_v57 = vadd.f32 1.0, %v1477_v56  ;;  %v1508_v56 = vld [vmem:[#allocation7] ss:$16 sps:$4 sm:$0xff]  }
 0x566   :  { %1478 = vrcp.f32 %v882_v57  ;;  %v1509_v57 = vld [vmem:[#allocation7 + $0x8] ss:$16 sps:$4 sm:$0xff]  }
 0x567   :  { %1480 = vtanh.f32 %v886_v58  ;;  %v1510_v58 = vld [vmem:[#allocation7 + $0x24] ss:$16 sps:$4 sm:$0xff]  }
 0x570   :  { %v1479_v59 = vpop.eup %1478 }
 0x571   :  { %v890_v60 = vrot.slane %v1479_v59, 2  ;;  %v1481_v61 = vpop.eup %1480  ;;  %v896_v38 = vrot.slane %v1479_v59, 4 }
 0x572   :  { %v893_v62 = vmul.f32 %v1481_v61, %v1479_v59  ;;  %v1511_v59 = vld [vmem:[#allocation7 + $0x2c] ss:$16 sps:$4 sm:$0xff]   ;;  %v1513_v61 = vld [vmem:[#allocation7 + $0x28] ss:$16 sps:$4 sm:$0xff]  }
 0x573   :  { %v892_v63 = vmul.f32 %v890_v60, %v1972_v34  ;;  %v1512_v60 = vld [vmem:[#allocation7 + $0x20] ss:$16 sps:$4 sm:$0xff]  }
 0x575   :  { %v2012_v27 = vadd.f32 %v893_v62, %v892_v63  ;;  %v1514_v62 = vld [vmem:[#allocation7 + $0x44] ss:$16 sps:$4 sm:$0xff]   ;;  %v1515_v63 = vld [vmem:[#allocation7 + $0x4c] ss:$16 sps:$4 sm:$0xff]  }
 0x577   :  { %1482 = vtanh.f32 %v2012_v27 }
 0x581   :  { %v1483_v39 = vpop.eup %1482 }
 0x582   :  { %v898_v40 = vmul.f32 %v1483_v39, %v896_v38  ;;  %v1517_v38 = vld [vmem:[#allocation7 + $0x48] ss:$16 sps:$4 sm:$0xff]  }
 0x584   :  { %v899_v41 = vpack.c.bf16 %v898_v40, %v898_v40 }
 0x586   :  { %901 = vst [vmem:[#allocation9 + $0x4] sm:$0x1] %v899_v41  ;;  %937 = vmatmul.mubr.bf16.vlgmr.msra.gmra.mrb[20].mxu0 %v899_v41  ;;  %978 = vmatmul.mubr.bf16.vlgmr.msra.gmra.mrb[20].mxu1 %v899_v41 }
 0x587   :  { %1035 = vmatpush1.bf16.msra.mxu0 %v1715_v3  ;;  %1076 = vmatpush1.bf16.msra.mxu1 %v1717_v4 }
 0x588   :  { %1036 = vmatprep.subr.bf16.mxu0 %v1720_v5  ;;  %1077 = vmatprep.subr.bf16.mxu1 %v1724_v6 }
 0x589   :  { %1066 = vmatprep.mubr.bf16.mxu0 %v1642_v0  ;;  %1107 = vmatprep.mubr.bf16.mxu1 %v1642_v0 }
 0x58b   :  { %1037 = vmatpush1.bf16.msra.mxu0 %v1726_v7  ;;  %1078 = vmatpush1.bf16.msra.mxu1 %v1729_v8 }
 0x58c   :  { %1038 = vmatprep.subr.bf16.mxu0 %v1732_v9  ;;  %1079 = vmatprep.subr.bf16.mxu1 %v1734_v10 }
 0x58f   :  { %1039 = vmatpush1.bf16.msra.mxu0 %v1736_v11  ;;  %1080 = vmatpush1.bf16.msra.mxu1 %v1738_v12 }
 0x590   :  { %1040 = vmatprep.subr.bf16.mxu0 %v1742_v13  ;;  %1081 = vmatprep.subr.bf16.mxu1 %v1746_v14 }
 0x593   :  { %1041 = vmatpush1.bf16.msra.mxu0 %v1748_v15  ;;  %1082 = vmatpush1.bf16.msra.mxu1 %v1752_v16 }
 0x594   :  { %1042 = vmatprep.subr.bf16.mxu0 %v1754_v17  ;;  %1083 = vmatprep.subr.bf16.mxu1 %v1758_v18 }
 0x597   :  { %1043 = vmatpush1.bf16.msra.mxu0 %v1760_v19  ;;  %1084 = vmatpush1.bf16.msra.mxu1 %v1762_v20 }
 0x598   :  { %1044 = vmatprep.subr.bf16.mxu0 %v1766_v21  ;;  %1085 = vmatprep.subr.bf16.mxu1 %v1770_v22 }
 0x59b   :  { %1045 = vmatpush1.bf16.msra.mxu0 %v1774_v23  ;;  %1086 = vmatpush1.bf16.msra.mxu1 %v1776_v24 }
 0x59c   :  { %1046 = vmatprep.subr.bf16.mxu0 %v1780_v25  ;;  %1087 = vmatprep.subr.bf16.mxu1 %v1782_v26 }
 0x59f   :  { %1047 = vmatpush1.bf16.msra.mxu0 %v1789_v28  ;;  %1088 = vmatpush1.bf16.msra.mxu1 %v1791_v29 }
 0x5a0   :  { %1048 = vmatprep.subr.bf16.mxu0 %v1795_v30  ;;  %1089 = vmatprep.subr.bf16.mxu1 %v1797_v31 }
 0x5a3   :  { %1049 = vmatpush1.bf16.msra.mxu0 %v1801_v32  ;;  %1090 = vmatpush1.bf16.msra.mxu1 %v1803_v33 }
 0x5a4   :  { %1164 = vmatprep.subr.bf16.mxu0 %v1710_v1  ;;  %1205 = vmatprep.subr.bf16.mxu1 %v1712_v2 }
 0x659   :  { %v938_v3 = vpop.f32.mrb[20].mxu0  ;;  %v979_v4 = vpop.f32.mrb[20].mxu1 }
 0x65a   :  { %v940_v5 = vpop.f32.mrb[21].mxu0  ;;  %v981_v6 = vpop.f32.mrb[21].mxu1 }
 0x65b   :  { %v990_v7 = vcombine.low %v938_v3, %v940_v5  ;;  %v991_v8 = vcombine.low %v979_v4, %v981_v6  ;;  %v942_v9 = vpop.f32.mrb[22].mxu0  ;;  %v983_v10 = vpop.f32.mrb[22].mxu1 }
 0x65c   :  { %v943_v11 = vpop.f32.mrb[23].mxu0  ;;  %v984_v12 = vpop.f32.mrb[23].mxu1 }
 0x65d   :  { %v998_v34 = vrot.slane %v990_v7, %v1848_v44  ;;  %v1005_v35 = vrot.slane %v991_v8, %v1848_v44 }
 0x65f   :  { %v1006_v37 = vcombine.low %v998_v34, %v1005_v35 }
 0x661   :  { %v1008_v42 = vadd.f32 %v1006_v37, %v903_v36 }
 0x663   :  { %v1381_v1 = vmul.f32 -1.442695, %v1008_v42  ;;  %v1016_v45 = vrot.slane %v1008_v42, 6 }
 0x665   :  { %1484 = vpow2.f32 %v1381_v1 }
 0x66f   :  { %v1485_v2 = vpop.eup %1484 }
 0x670   :  { %v1012_v43 = vadd.f32 1.0, %v1485_v2 }
 0x672   :  { %1486 = vrcp.f32 %v1012_v43  ;;  %v1163_v43 = vld [vmem:[#allocation4 + $0x38] sm:$0xff] }
 0x673   :  { %1488 = vtanh.f32 %v1016_v45 }
 0x67c   :  { %v1487_v46 = vpop.eup %1486 }
 0x67d   :  { %v1020_v47 = vrot.slane %v1487_v46, 2  ;;  %v1489_v48 = vpop.eup %1488  ;;  %v1026_v52 = vrot.slane %v1487_v46, 4 }
 0x67e   :  { %v1023_v49 = vmul.f32 %v1489_v48, %v1487_v46 }
 0x67f   :  { %v1022_v50 = vmul.f32 %v1020_v47, %v2012_v27  ;;  %v1516_v27 = vld [vmem:[#allocation7 + $0x40] ss:$16 sps:$4 sm:$0xff]  }
 0x681   :  { %v2052_v51 = vadd.f32 %v1023_v49, %v1022_v50 }
 0x683   :  { %1490 = vtanh.f32 %v2052_v51 }
 0x68d   :  { %v1491_v53 = vpop.eup %1490 }
 0x68e   :  { %v1028_v54 = vmul.f32 %v1491_v53, %v1026_v52 }
 0x690   :  { %v1029_v55 = vpack.c.bf16 %v1028_v54, %v1028_v54 }
 0x692   :  { %1031 = vst [vmem:[#allocation9 + $0x5] sm:$0x1] %v1029_v55  ;;  %1067 = vmatmul.mubr.bf16.vlgmr.msra.gmra.mrb[24].mxu0 %v1029_v55  ;;  %1108 = vmatmul.mubr.bf16.vlgmr.msra.gmra.mrb[24].mxu1 %v1029_v55 }
 0x693   :  { %1165 = vmatpush1.bf16.msra.mxu0 %v1508_v56  ;;  %1206 = vmatpush1.bf16.msra.mxu1 %v1509_v57 }
 0x694   :  { %1166 = vmatprep.subr.bf16.mxu0 %v1510_v58  ;;  %1207 = vmatprep.subr.bf16.mxu1 %v1511_v59 }
 0x695   :  { %1196 = vmatprep.mubr.bf16.mxu0 %v1642_v0  ;;  %1237 = vmatprep.mubr.bf16.mxu1 %v1642_v0 }
 0x697   :  { %1167 = vmatpush1.bf16.msra.mxu0 %v1512_v60  ;;  %1208 = vmatpush1.bf16.msra.mxu1 %v1513_v61 }
 0x698   :  { %1168 = vmatprep.subr.bf16.mxu0 %v1514_v62  ;;  %1209 = vmatprep.subr.bf16.mxu1 %v1515_v63 }
 0x69b   :  { %1169 = vmatpush1.bf16.msra.mxu0 %v1516_v27  ;;  %1210 = vmatpush1.bf16.msra.mxu1 %v1517_v38 }
 0x69c   :  { %1170 = vmatprep.subr.bf16.mxu0 %v1742_v13  ;;  %1211 = vmatprep.subr.bf16.mxu1 %v1746_v14 }
 0x69f   :  { %1171 = vmatpush1.bf16.msra.mxu0 %v1748_v15  ;;  %1212 = vmatpush1.bf16.msra.mxu1 %v1752_v16 }
 0x6a0   :  { %1172 = vmatprep.subr.bf16.mxu0 %v1754_v17  ;;  %1213 = vmatprep.subr.bf16.mxu1 %v1758_v18 }
 0x6a3   :  { %1173 = vmatpush1.bf16.msra.mxu0 %v1760_v19  ;;  %1214 = vmatpush1.bf16.msra.mxu1 %v1762_v20 }
 0x6a4   :  { %1174 = vmatprep.subr.bf16.mxu0 %v1766_v21  ;;  %1215 = vmatprep.subr.bf16.mxu1 %v1770_v22 }
 0x6a7   :  { %1175 = vmatpush1.bf16.msra.mxu0 %v1774_v23  ;;  %1216 = vmatpush1.bf16.msra.mxu1 %v1776_v24  ;;  %v1033_v24 = vld [vmem:[#allocation4 + $0x30] sm:$0xff] }
 0x6a8   :  { %1176 = vmatprep.subr.bf16.mxu0 %v1780_v25  ;;  %1217 = vmatprep.subr.bf16.mxu1 %v1782_v26 }
 0x6ab   :  { %1177 = vmatpush1.bf16.msra.mxu0 %v1789_v28  ;;  %1218 = vmatpush1.bf16.msra.mxu1 %v1791_v29 }
 0x6ac   :  { %1178 = vmatprep.subr.bf16.mxu0 %v1795_v30  ;;  %1219 = vmatprep.subr.bf16.mxu1 %v1797_v31 }
 0x6af   :  { %1179 = vmatpush1.bf16.msra.mxu0 %v1801_v32  ;;  %1220 = vmatpush1.bf16.msra.mxu1 %v1803_v33 }
 0x765   :  { %v1068_v0 = vpop.f32.mrb[24].mxu0  ;;  %v1109_v13 = vpop.f32.mrb[24].mxu1 }
 0x766   :  { %v1070_v14 = vpop.f32.mrb[25].mxu0  ;;  %v1111_v15 = vpop.f32.mrb[25].mxu1 }
 0x767   :  { %v1120_v16 = vcombine.low %v1068_v0, %v1070_v14  ;;  %v1121_v17 = vcombine.low %v1109_v13, %v1111_v15  ;;  %v1072_v18 = vpop.f32.mrb[26].mxu0  ;;  %v1113_v19 = vpop.f32.mrb[26].mxu1 }
 0x768   :  { %v1073_v20 = vpop.f32.mrb[27].mxu0  ;;  %v1114_v21 = vpop.f32.mrb[27].mxu1 }
 0x769   :  { %v1128_v22 = vrot.slane %v1120_v16, %v1848_v44  ;;  %v1135_v23 = vrot.slane %v1121_v17, %v1848_v44 }
 0x76b   :  { %v1136_v25 = vcombine.low %v1128_v22, %v1135_v23 }
 0x76d   :  { %v1138_v26 = vadd.f32 %v1136_v25, %v1033_v24 }
 0x76f   :  { %v1382_v28 = vmul.f32 -1.442695, %v1138_v26  ;;  %v1146_v31 = vrot.slane %v1138_v26, 6 }
 0x771   :  { %1492 = vpow2.f32 %v1382_v28 }
 0x77b   :  { %v1493_v29 = vpop.eup %1492 }
 0x77c   :  { %v1142_v30 = vadd.f32 1.0, %v1493_v29 }
 0x77e   :  { %1494 = vrcp.f32 %v1142_v30 }
 0x77f   :  { %1496 = vtanh.f32 %v1146_v31 }
 0x788   :  { %v1495_v32 = vpop.eup %1494 }
 0x789   :  { %v1150_v33 = vrot.slane %v1495_v32, 2  ;;  %v1497_v39 = vpop.eup %1496  ;;  %v1156_v4 = vrot.slane %v1495_v32, 4 }
 0x78a   :  { %v1153_v40 = vmul.f32 %v1497_v39, %v1495_v32 }
 0x78b   :  { %v1152_v41 = vmul.f32 %v1150_v33, %v2052_v51 }
 0x78d   :  { %v1154_v3 = vadd.f32 %v1153_v40, %v1152_v41 }
 0x78f   :  { %1498 = vtanh.f32 %v1154_v3 }
 0x799   :  { %v1499_v5 = vpop.eup %1498 }
 0x79a   :  { %v1158_v6 = vmul.f32 %v1499_v5, %v1156_v4 }
 0x79c   :  { %v1159_v7 = vpack.c.bf16 %v1158_v6, %v1158_v6 }
 0x79e   :  { %1161 = vst [vmem:[#allocation9 + $0x6] sm:$0x1] %v1159_v7  ;;  %1197 = vmatmul.mubr.bf16.vlgmr.msra.gmra.mrb[28].mxu0 %v1159_v7  ;;  %1238 = vmatmul.mubr.bf16.vlgmr.msra.gmra.mrb[28].mxu1 %v1159_v7 }
 0x871   :  { %v1198_v8 = vpop.f32.mrb[28].mxu0  ;;  %v1239_v9 = vpop.f32.mrb[28].mxu1 }
 0x872   :  { %v1200_v10 = vpop.f32.mrb[29].mxu0  ;;  %v1241_v11 = vpop.f32.mrb[29].mxu1 }
 0x873   :  { %v1250_v12 = vcombine.low %v1198_v8, %v1200_v10  ;;  %v1251_v34 = vcombine.low %v1239_v9, %v1241_v11  ;;  %v1202_v35 = vpop.f32.mrb[30].mxu0  ;;  %v1243_v36 = vpop.f32.mrb[30].mxu1 }
 0x874   :  { %v1203_v37 = vpop.f32.mrb[31].mxu0  ;;  %v1244_v42 = vpop.f32.mrb[31].mxu1 }
 0x875   :  { %v1258_v1 = vrot.slane %v1250_v12, %v1848_v44  ;;  %v1265_v2 = vrot.slane %v1251_v34, %v1848_v44 }
 0x877   :  { %v1266_v45 = vcombine.low %v1258_v1, %v1265_v2 }
 0x879   :  { %v1268_v46 = vadd.f32 %v1266_v45, %v1163_v43 }
 0x87b   :  { %v1383_v47 = vmul.f32 -1.442695, %v1268_v46  ;;  %v1276_v50 = vrot.slane %v1268_v46, 6 }
 0x87d   :  { %1500 = vpow2.f32 %v1383_v47 }
 0x887   :  { %v1501_v48 = vpop.eup %1500 }
 0x888   :  { %v1272_v49 = vadd.f32 1.0, %v1501_v48 }
 0x88a   :  { %1502 = vrcp.f32 %v1272_v49 }
 0x88b   :  { %1504 = vtanh.f32 %v1276_v50 }
 0x894   :  { %v1503_v51 = vpop.eup %1502 }
 0x895   :  { %v1280_v52 = vrot.slane %v1503_v51, 2  ;;  %v1505_v53 = vpop.eup %1504  ;;  %v1286_v44 = vrot.slane %v1503_v51, 4 }
 0x896   :  { %v1283_v54 = vmul.f32 %v1505_v53, %v1503_v51 }
 0x897   :  { %v1282_v55 = vmul.f32 %v1280_v52, %v1154_v3 }
 0x899   :  { %v1284_v56 = vadd.f32 %v1283_v54, %v1282_v55 }
 0x89b   :  { %1506 = vtanh.f32 %v1284_v56  ;;  %1293 = vst [vmem:[#allocation3] sm:$0x3] %v1284_v56  ;;  %1298 = vst [vmem:[#allocation12] sm:$0x3] %v1284_v56 }
 0x8a5   :  { %v1507_v57 = vpop.eup %1506 }
 0x8a6   :  { %v1288_v58 = vmul.f32 %v1507_v57, %v1286_v44 }
 0x8a8   :  { %v1289_v59 = vpack.c.bf16 %v1288_v58, %v1288_v58  ;;  %1292 = vst [vmem:[#allocation2] sm:$0x3] %v1288_v58  ;;  %1297 = vst [vmem:[#allocation10] sm:$0x3] %v1288_v58 }
 0x8a9   :  { %1573 = shalt.err (!%p1570_p6)
}
 0x8aa   :  { %s1574_s10 = scalar_lea.hbm %s2139_s5, 32 }
 0x8ab   :  { %p1575_p7 = scmp.ne.s32.totalorder %s2139_s5, %s1574_s10  ;;  %p1578_p8 = scmp.lt.u32.totalorder %s1574_s10, %s2139_s5 }
 0x8ad   :  { %p1580_p9 = pnand %p1578_p8, %p1575_p7 }
 0x8af   :  { %1583 = shalt.err (!%p1580_p9)
}
 0x8b0   :  { %1320 = dma.vmem_to_hbm [thread:$0]  %s1318_s26, 32, %s2139_s5, [#allocation11]   ;;  %1291 = vst [vmem:[#allocation9 + $0x7] sm:$0x1] %v1289_v59 }
 0x8b1   :  { %s1584_s17 = scalar_lea.vmem %s2082_s28, 32  ;;  %p1589_p11 = scmp.lt.s32.totalorder %s2082_s28, %s2082_s28 }
 0x8b2   :  { %p1585_p10 = scmp.ne.s32.totalorder %s2082_s28, %s1584_s17  ;;  %p1590_p12 = scmp.lt.s32.totalorder %s1584_s17, %s1584_s17 }
 0x8b4   :  { %p1591_p13 = por %p1590_p12, %p1589_p11 }
 0x8b6   :  { %p1592_p0 = pnand %p1591_p13, %p1585_p10 }
 0x8b8   :  { %1595 = shalt.err (!%p1592_p0)
}
 0x8b9   :  { %s1596_s20 = scalar_lea.hbm %s2140_s6, 32 }
 0x8ba   :  { %p1597_p1 = scmp.ne.s32.totalorder %s2140_s6, %s1596_s20  ;;  %p1600_p2 = scmp.lt.u32.totalorder %s1596_s20, %s2140_s6 }
 0x8bc   :  { %p1602_p3 = pnand %p1600_p2, %p1597_p1 }
 0x8be   :  { %1605 = shalt.err (!%p1602_p3)
}
 0x8bf   :  { %1330 = dma.vmem_to_hbm [thread:$0]  %s2082_s28, 32, %s2140_s6, [#allocation11]  }
 0x8c0   :  { %s1606_s2 = scalar_lea.vmem %s2084_s30, 128  ;;  %p1611_p5 = scmp.lt.s32.totalorder %s2084_s30, %s2084_s30 }
 0x8c1   :  { %p1607_p4 = scmp.ne.s32.totalorder %s2084_s30, %s1606_s2  ;;  %p1612_p6 = scmp.lt.s32.totalorder %s1606_s2, %s1606_s2 }
 0x8c3   :  { %p1613_p7 = por %p1612_p6, %p1611_p5 }
 0x8c5   :  { %p1614_p8 = pnand %p1613_p7, %p1607_p4 }
 0x8c7   :  { %1617 = shalt.err (!%p1614_p8)
}
 0x8c8   :  { %s1618_s26 = scalar_lea.hbm %s2138_s4, 128 }
 0x8c9   :  { %p1619_p9 = scmp.ne.s32.totalorder %s2138_s4, %s1618_s26  ;;  %p1622_p10 = scmp.lt.u32.totalorder %s1618_s26, %s2138_s4 }
 0x8cb   :  { %p1624_p11 = pnand %p1622_p10, %p1619_p9 }
 0x8cd   :  { %1627 = shalt.err (!%p1624_p11)
}
 0x8ce   :  { %s1647_s6 = smov 1  }
 0x8cf   :  { %1310 = dma.vmem_to_hbm [thread:$0]  %s2084_s30, 128, %s2138_s4, [#allocation6], %s1641_s21, %s1641_s21, %s1647_s6  }
 0x8d0   :  { %1632 = dma.done.wait [#allocation6], 128  }
 0x8d1   :  { %1633 = vsyncadd [#allocation6], 4294967168 }
 0x8d2   :  { %1634 = dma.done.wait [#allocation11], 64  }
 0x8d3   :  { %1635 = vsyncadd [#allocation11], 4294967232 }
 0x8d4   :  { %1340 = vsyncpa [#allocation5], 1 }
 0x8d5   :  { %1341 = vsyncpa [#allocation8], 1 }
 0x8d6   :  { %1342 = vsyncpa [#allocation6], 1 }
 0x8d7   :  { %1343 = vsyncpa [#allocation11], 1 }

</bundles_post_ra>
